<compile_context>
chip_gen: v6e
topology: v6e:2x2x1
jax: 0.10.0
libtpu: 0.0.40
codegen_flags: <defaults>
</compile_context>

<pallas_src>
import functools

import jax
import jax.numpy as jnp
from jax.experimental import pallas as pl
from jax.experimental.pallas import tpu as pltpu


# ----------------------------- in-kernel math -------------------------------

def _erf(x):
    # Abramowitz & Stegun 7.1.26 polynomial (max abs err ~1.5e-7 for the
    # polynomial, ~1e-4 with the approximate reciprocal).  The divide goes to
    # the EUP via pl.reciprocal(approx=True); the rest is VPU mul/add plus one
    # EUP exp.
    a1, a2, a3, a4, a5 = 0.254829592, -0.284496736, 1.421413741, -1.453152027, 1.061405429
    p = 0.3275911
    sgn = jnp.where(x >= 0.0, 1.0, -1.0)
    ax = jnp.abs(x)
    t = pl.reciprocal(1.0 + p * ax, approx=True)
    poly = ((((a5 * t + a4) * t + a3) * t + a2) * t + a1) * t
    return sgn * (1.0 - poly * jnp.exp(-ax * ax))


def _gelu_exact(x):
    # nn.GELU() default (approximate='none'): 0.5 * x * (1 + erf(x / sqrt(2)))
    return 0.5 * x * (1.0 + _erf(x * 0.7071067811865476))


# ------------------------------- kernel 1 ------------------------------------
# 1x1 conv (channel-major bf16 matmul) + per-batch partial BN statistics.

def conv1_stats_kernel(x_ref, w1t_ref, b1_ref, y_ref, psum_ref, psq_ref):
    # x_ref: (1, Cin, HW) bf16   w1t_ref: (E, Cin) bf16   b1_ref: (E, 1) f32
    acc = jnp.dot(w1t_ref[...], x_ref[0],
                  preferred_element_type=jnp.float32) + b1_ref[...]
    # BN partial stats from the f32 accumulator (before the bf16 downcast);
    # the tiny cross-batch reduction happens in the wrapper -> no serialized
    # accumulator, both TCs usable on v7x.
    psum_ref[0] = jnp.sum(acc, axis=1, keepdims=True)
    psq_ref[0] = jnp.sum(acc * acc, axis=1, keepdims=True)
    y_ref[0] = acc.astype(y_ref.dtype)


# ------------------------------- kernel 2 ------------------------------------
# Folded affine + exact GELU + 3x3 conv as nine accumulated bf16 matmuls.

def fused_affine_gelu_conv2_kernel(W, y_ref, sc_ref, sh_ref, mask_ref,
                                   w2_ref, b2_ref, o_ref):
    # y_ref: (1, E, HW) bf16      sc/sh_ref: (1, E, 1) f32 folded affine
    # mask_ref: (9, HW) f32       w2_ref: (9, L, E) bf16   b2_ref: (L, 1) f32
    HW = y_ref.shape[2]
    L = o_ref.shape[1]

    # Single folded (BatchNorm x time) affine + exact GELU, all in f32.
    a = y_ref[0].astype(jnp.float32) * sc_ref[0] + sh_ref[0]
    ab = _gelu_exact(a).astype(jnp.bfloat16)        # one downcast for the MXU

    masks = mask_ref[...]                           # (9, HW) tap-validity

    # 3x3 "same" conv: nine accumulated (L,E)x(E,HW) bf16 matmuls (no im2col
    # scratch).  Roll and mask commute with the channel contraction, so the
    # spatial tap shift is done on the small (L,HW) result instead of the
    # (E,HW) input: 8x less XLU/VPU work, rolls stay f32, chained `acc +` on
    # v7x maps to in-place MRB accumulation of the dots.
    acc = jnp.zeros((L, HW), jnp.float32)
    for k in range(9):
        dy, dx = k // 3 - 1, k % 3 - 1
        c = jnp.dot(w2_ref[k], ab, preferred_element_type=jnp.float32)
        s = (-(dy * W + dx)) % HW                   # static lane-roll amount
        if s:
            c = pltpu.roll(c, s, 1)
        if k != 4:                                  # center tap: all valid
            c = c * masks[k:k + 1, :]
        acc = acc + c

    # (L, HW) output is lane-dense -> unmasked vst store path.
    o_ref[0] = (acc + b2_ref[...]).astype(o_ref.dtype)


# -------------------------------- wrapper ------------------------------------

@jax.jit
def mask_withtime_forward(x_nchw, t, params):
    N, Cin, H, W = x_nchw.shape
    E = params["w1"].shape[1]
    L = params["w2"].shape[2]
    HW = H * W
    M = N * HW

    # Channel-major views: reshapes only, no layout transposes.  bf16 MXU
    # operands halve the dominant HBM traffic; all accumulation stays f32.
    x3 = x_nchw.reshape(N, Cin, HW).astype(jnp.bfloat16)
    w1t = params["w1"].T.astype(jnp.bfloat16)                   # (E, Cin)
    b1c = params["b1"].reshape(E, 1).astype(jnp.float32)

    # --- stage 1: conv_1 (1x1) + per-batch BN partial stats ------------------
    # TODO(synk): at production H,W also tile the HW axis of this grid so the
    # (Cin, HW) block stays inside the per-generation VMEM budget.
    y, psum, psq = pl.pallas_call(
        conv1_stats_kernel,
        out_shape=(jax.ShapeDtypeStruct((N, E, HW), jnp.bfloat16),
                   jax.ShapeDtypeStruct((N, E, 1), jnp.float32),
                   jax.ShapeDtypeStruct((N, E, 1), jnp.float32)),
        grid_spec=pltpu.PrefetchScalarGridSpec(
            num_scalar_prefetch=0,
            grid=(N,),
            in_specs=[pl.BlockSpec((1, Cin, HW), lambda n: (n, 0, 0)),
                      pl.BlockSpec((E, Cin), lambda n: (0, 0)),
                      pl.BlockSpec((E, 1), lambda n: (0, 0))],
            out_specs=(pl.BlockSpec((1, E, HW), lambda n: (n, 0, 0)),
                       pl.BlockSpec((1, E, 1), lambda n: (n, 0, 0)),
                       pl.BlockSpec((1, E, 1), lambda n: (n, 0, 0)))),
        compiler_params=pltpu.CompilerParams(
            dimension_semantics=("parallel",)),
    )(x3, w1t, b1c)

    # Fold training-mode (batch-stat, biased-variance) BatchNorm into
    # per-channel scale/shift.
    # TODO(synk): for very large N*H*W switch to a two-pass / Welford scheme;
    # E[y^2]-E[y]^2 in f32 can cancel catastrophically when |mean| >> std.
    tot = jnp.sum(psum, axis=0)                                 # (E, 1)
    totsq = jnp.sum(psq, axis=0)                                # (E, 1)
    mean = tot / M
    var = totsq / M - mean * mean
    nscale = params["gamma"].reshape(E, 1) / jnp.sqrt(var + 1e-5)
    nshift = params["beta"].reshape(E, 1) - mean * nscale

    # time MLP: SiLU -> Linear(time_dim, 2E).  Tiny (N x time_dim); plain JAX.
    te = jax.nn.silu(t.astype(jnp.float32)) @ params["wt"] + params["bt"]
    tscale = te[:, :E].reshape(N, E, 1)
    tshift = te[:, E:].reshape(N, E, 1)

    # Fold BN affine and time scale/shift into ONE per-(batch,channel) affine:
    #   (y*nscale + nshift)*(tscale+1) + tshift  ==  y*sc + sh
    tp1 = tscale + 1.0
    sc = (nscale[None, :, :] * tp1).astype(jnp.float32)         # (N, E, 1)
    sh = (nshift[None, :, :] * tp1 + tshift).astype(jnp.float32)

    # conv_2 weights tap-major (9, L, E) bf16 + (9, HW) tap-validity masks.
    # Under jit the masks are shape-only constants and fold away.
    w2t = params["w2"].transpose(0, 2, 1).astype(jnp.bfloat16)  # (9, L, E)
    b2c = params["b2"].reshape(L, 1).astype(jnp.float32)

    hh = jnp.arange(HW, dtype=jnp.int32) // W
    ww = jnp.arange(HW, dtype=jnp.int32) % W
    mask_rows = []
    for k in range(9):
        dy, dx = k // 3 - 1, k % 3 - 1
        valid = ((hh + dy >= 0) & (hh + dy < H) &
                 (ww + dx >= 0) & (ww + dx < W))
        mask_rows.append(valid.astype(jnp.float32))
    masks = jnp.stack(mask_rows, axis=0)                        # (9, HW)

    # --- stage 2: folded affine + GELU + conv_2 (3x3, pad=1) -----------------
    # TODO(synk): at production H,W (e.g. 256x256) tile a 2-D grid
    # (N, n_row_strips) with BOTH axes "parallel", a 1-row halo per strip, and
    # strip height derived from the per-generation VMEM budget (~half on
    # v7x's 64 MiB vs v5e/v6e's 128 MiB); never split HW below 128 lanes.
    out = pl.pallas_call(
        functools.partial(fused_affine_gelu_conv2_kernel, W),
        out_shape=jax.ShapeDtypeStruct((N, L, HW), jnp.float32),
        grid_spec=pltpu.PrefetchScalarGridSpec(
            num_scalar_prefetch=0,
            grid=(N,),
            in_specs=[pl.BlockSpec((1, E, HW), lambda n: (n, 0, 0)),
                      pl.BlockSpec((1, E, 1), lambda n: (n, 0, 0)),
                      pl.BlockSpec((1, E, 1), lambda n: (n, 0, 0)),
                      pl.BlockSpec((9, HW), lambda n: (0, 0)),
                      pl.BlockSpec((9, L, E), lambda n: (0, 0, 0)),
                      pl.BlockSpec((L, 1), lambda n: (0, 0))],
            out_specs=pl.BlockSpec((1, L, HW), lambda n: (n, 0, 0))),
        compiler_params=pltpu.CompilerParams(
            dimension_semantics=("parallel",)),
    )(y, sc, sh, masks, w2t, b2c)

    return out.reshape(N, L, H, W)      # channel-major already -> free reshape


# --------------------------- pure-JAX reference ------------------------------

def reference(x_nchw, t, params):
    E = params["w1"].shape[1]
    with jax.default_matmul_precision("highest"):
        y = jnp.einsum("nchw,co->nohw", x_nchw, params["w1"]) \
            + params["b1"][None, :, None, None]
        mean = y.mean(axis=(0, 2, 3))
        var = y.var(axis=(0, 2, 3))
        yh = (y - mean[None, :, None, None]) / jnp.sqrt(var + 1e-5)[None, :, None, None]
        yh = yh * params["gamma"][None, :, None, None] + params["beta"][None, :, None, None]
        te = jax.nn.silu(t) @ params["wt"] + params["bt"]
        sc, sh = te[:, :E], te[:, E:]
        z = yh * (sc[:, :, None, None] + 1.0) + sh[:, :, None, None]
        z = jax.nn.gelu(z, approximate=False)
        zn = jnp.transpose(z, (0, 2, 3, 1))
        w2 = params["w2"].reshape(3, 3, E, -1)
        o = jax.lax.conv_general_dilated(
            zn, w2, (1, 1), "SAME", dimension_numbers=("NHWC", "HWIO", "NHWC"))
        o = o + params["b2"][None, None, None, :]
    return jnp.transpose(o, (0, 3, 1, 2))


# ----------------------------------- main ------------------------------------

if __name__ == "__main__":
    embed_dim, num_layer, time_dim = 32, 4, 32
    N, H, W = 2, 16, 16
    Cin = embed_dim * num_layer

    key = jax.random.PRNGKey(0)
    ks = jax.random.split(key, 10)
    params = dict(
        # conv_1: Conv2d(Cin, E, 1) -> weight stored as (Cin, E)
        w1=0.05 * jax.random.normal(ks[0], (Cin, embed_dim), jnp.float32),
        b1=0.05 * jax.random.normal(ks[1], (embed_dim,), jnp.float32),
        # BatchNorm2d(E) affine params
        gamma=1.0 + 0.05 * jax.random.normal(ks[2], (embed_dim,), jnp.float32),
        beta=0.05 * jax.random.normal(ks[3], (embed_dim,), jnp.float32),
        # time_mlp Linear(time_dim, 2E) stored as (time_dim, 2E)
        wt=0.05 * jax.random.normal(ks[4], (time_dim, 2 * embed_dim), jnp.float32),
        bt=0.05 * jax.random.normal(ks[5], (2 * embed_dim,), jnp.float32),
        # conv_2: Conv2d(E, L, 3, padding=1) stored HWIO-flattened as (9, E, L)
        w2=0.05 * jax.random.normal(ks[6], (9, embed_dim, num_layer), jnp.float32),
        b2=0.05 * jax.random.normal(ks[7], (num_layer,), jnp.float32),
    )

    x = jax.random.normal(ks[8], (N, Cin, H, W), jnp.float32)
    t = jax.random.normal(ks[9], (N, time_dim), jnp.float32)

    out = jax.block_until_ready(mask_withtime_forward(x, t, params))
    assert out.shape == (N, num_layer, H, W), out.shape

    ref = jax.block_until_ready(reference(x, t, params))
    max_err = float(jnp.max(jnp.abs(out - ref)))
    # bf16 MXU operands + bf16 inter-stage tensor -> validate at 3e-2.
    assert jnp.allclose(out, ref, atol=3e-2, rtol=3e-2), f"max abs err {max_err}"

    print("KERNEL_OK")
</pallas_src>

<mosaic_0001>
module attributes {stable_mosaic.version = 11 : i64} {
  func.func @conv1_stats_kernel(%arg0: i32, %arg1: memref<1x128x256xbf16, #tpu.memory_space<vmem>>, %arg2: memref<32x128xbf16, #tpu.memory_space<vmem>>, %arg3: memref<32x1xf32, #tpu.memory_space<vmem>>, %arg4: memref<1x32x256xbf16, #tpu.memory_space<vmem>>, %arg5: memref<1x32x1xf32, #tpu.memory_space<vmem>>, %arg6: memref<1x32x1xf32, #tpu.memory_space<vmem>>) attributes {dimension_semantics = [#tpu.dimension_semantics<parallel>], iteration_bounds = array<i64: 2>, scalar_prefetch = 0 : i64, scratch_operands = 0 : i64, tpu.core_type = #tpu.core_type<tc>, window_params = [{transform_indices = @transform_0, window_bounds = array<i64: 1, 128, 256>}, {pipeline_mode = #tpu.pipeline_mode<synchronous>, transform_indices = @transform_1, window_bounds = array<i64: 32, 128>}, {pipeline_mode = #tpu.pipeline_mode<synchronous>, transform_indices = @transform_2, window_bounds = array<i64: 32, 1>}, {transform_indices = @transform_3, window_bounds = array<i64: 1, 32, 256>}, {transform_indices = @transform_4, window_bounds = array<i64: 1, 32, 1>}, {transform_indices = @transform_5, window_bounds = array<i64: 1, 32, 1>}]} {
    %c0 = arith.constant 0 : index
    %c0_0 = arith.constant 0 : index
    %0 = vector.load %arg2[%c0, %c0_0] : memref<32x128xbf16, #tpu.memory_space<vmem>>, vector<32x128xbf16>
    %c0_1 = arith.constant 0 : index
    %c0_2 = arith.constant 0 : index
    %c0_3 = arith.constant 0 : index
    %1 = vector.load %arg1[%c0_1, %c0_2, %c0_3] : memref<1x128x256xbf16, #tpu.memory_space<vmem>>, vector<1x128x256xbf16>
    %2 = vector.shape_cast %1 : vector<1x128x256xbf16> to vector<128x256xbf16>
    %cst = arith.constant dense<0.000000e+00> : vector<32x256xf32>
    %3 = tpu.matmul %0, %2, %cst {dimension_numbers = #tpu.dot_dimension_numbers<[1], [0], [0], [1], [0, 0, 1, 1], [], []>} : vector<32x128xbf16>, vector<128x256xbf16>, vector<32x256xf32> -> vector<32x256xf32>
    %c0_4 = arith.constant 0 : index
    %c0_5 = arith.constant 0 : index
    %4 = vector.load %arg3[%c0_4, %c0_5] : memref<32x1xf32, #tpu.memory_space<vmem>>, vector<32x1xf32>
    %5 = vector.broadcast %4 : vector<32x1xf32> to vector<32x256xf32>
    %6 = arith.addf %3, %5 : vector<32x256xf32>
    %cst_6 = arith.constant dense<0.000000e+00> : vector<32xf32>
    %7 = vector.multi_reduction <add>, %6, %cst_6 [1] : vector<32x256xf32> to vector<32xf32>
    %8 = vector.shape_cast %7 : vector<32xf32> to vector<32x1xf32>
    %c0_7 = arith.constant 0 : index
    %c0_8 = arith.constant 0 : index
    %c0_9 = arith.constant 0 : index
    %9 = vector.load %arg5[%c0_7, %c0_8, %c0_9] : memref<1x32x1xf32, #tpu.memory_space<vmem>>, vector<1x32x1xf32>
    %10 = vector.shape_cast %9 : vector<1x32x1xf32> to vector<32x1xf32>
    %11 = vector.shape_cast %8 : vector<32x1xf32> to vector<1x32x1xf32>
    tpu.vector_store %arg5[%c0_7, %c0_8, %c0_9], %11 {strides = array<i32>} : memref<1x32x1xf32, #tpu.memory_space<vmem>>, vector<1x32x1xf32>,
    %12 = arith.mulf %6, %6 : vector<32x256xf32>
    %cst_10 = arith.constant dense<0.000000e+00> : vector<32xf32>
    %13 = vector.multi_reduction <add>, %12, %cst_10 [1] : vector<32x256xf32> to vector<32xf32>
    %14 = vector.shape_cast %13 : vector<32xf32> to vector<32x1xf32>
    %c0_11 = arith.constant 0 : index
    %c0_12 = arith.constant 0 : index
    %c0_13 = arith.constant 0 : index
    %15 = vector.load %arg6[%c0_11, %c0_12, %c0_13] : memref<1x32x1xf32, #tpu.memory_space<vmem>>, vector<1x32x1xf32>
    %16 = vector.shape_cast %15 : vector<1x32x1xf32> to vector<32x1xf32>
    %17 = vector.shape_cast %14 : vector<32x1xf32> to vector<1x32x1xf32>
    tpu.vector_store %arg6[%c0_11, %c0_12, %c0_13], %17 {strides = array<i32>} : memref<1x32x1xf32, #tpu.memory_space<vmem>>, vector<1x32x1xf32>,
    %18 = arith.truncf %6 : vector<32x256xf32> to vector<32x256xbf16>
    %c0_14 = arith.constant 0 : index
    %c0_15 = arith.constant 0 : index
    %c0_16 = arith.constant 0 : index
    %19 = vector.load %arg4[%c0_14, %c0_15, %c0_16] : memref<1x32x256xbf16, #tpu.memory_space<vmem>>, vector<1x32x256xbf16>
    %20 = vector.shape_cast %19 : vector<1x32x256xbf16> to vector<32x256xbf16>
    %21 = vector.shape_cast %18 : vector<32x256xbf16> to vector<1x32x256xbf16>
    tpu.vector_store %arg4[%c0_14, %c0_15, %c0_16], %21 {strides = array<i32>} : memref<1x32x256xbf16, #tpu.memory_space<vmem>>, vector<1x32x256xbf16>,
    return
  }
  func.func @transform_0(%arg0: i32) -> (i32, i32, i32) {
    %c0_i32 = arith.constant 0 : i32
    %c0_i32_0 = arith.constant 0 : i32
    %c0_i32_1 = arith.constant 0 : i32
    return %arg0, %c0_i32, %c0_i32_0 : i32, i32, i32
  }
  func.func @transform_1(%arg0: i32) -> (i32, i32) {
    %c0_i32 = arith.constant 0 : i32
    %c0_i32_0 = arith.constant 0 : i32
    %c0_i32_1 = arith.constant 0 : i32
    return %c0_i32, %c0_i32_0 : i32, i32
  }
  func.func @transform_2(%arg0: i32) -> (i32, i32) {
    %c0_i32 = arith.constant 0 : i32
    %c0_i32_0 = arith.constant 0 : i32
    %c0_i32_1 = arith.constant 0 : i32
    return %c0_i32, %c0_i32_0 : i32, i32
  }
  func.func @transform_3(%arg0: i32) -> (i32, i32, i32) {
    %c0_i32 = arith.constant 0 : i32
    %c0_i32_0 = arith.constant 0 : i32
    %c0_i32_1 = arith.constant 0 : i32
    return %arg0, %c0_i32, %c0_i32_0 : i32, i32, i32
  }
  func.func @transform_4(%arg0: i32) -> (i32, i32, i32) {
    %c0_i32 = arith.constant 0 : i32
    %c0_i32_0 = arith.constant 0 : i32
    %c0_i32_1 = arith.constant 0 : i32
    return %arg0, %c0_i32, %c0_i32_0 : i32, i32, i32
  }
  func.func @transform_5(%arg0: i32) -> (i32, i32, i32) {
    %c0_i32 = arith.constant 0 : i32
    %c0_i32_0 = arith.constant 0 : i32
    %c0_i32_1 = arith.constant 0 : i32
    return %arg0, %c0_i32, %c0_i32_0 : i32, i32, i32
  }
}

module attributes {stable_mosaic.version = 11 : i64} {
  func.func @fused_affine_gelu_conv2_kernel(%arg0: i32, %arg1: memref<1x32x256xbf16, #tpu.memory_space<vmem>>, %arg2: memref<1x32x1xf32, #tpu.memory_space<vmem>>, %arg3: memref<1x32x1xf32, #tpu.memory_space<vmem>>, %arg4: memref<9x256xf32, #tpu.memory_space<vmem>>, %arg5: memref<9x4x32xbf16, #tpu.memory_space<vmem>>, %arg6: memref<4x1xf32, #tpu.memory_space<vmem>>, %arg7: memref<1x4x256xf32, #tpu.memory_space<vmem>>) attributes {dimension_semantics = [#tpu.dimension_semantics<parallel>], iteration_bounds = array<i64: 2>, scalar_prefetch = 0 : i64, scratch_operands = 0 : i64, tpu.core_type = #tpu.core_type<tc>, window_params = [{transform_indices = @transform_0, window_bounds = array<i64: 1, 32, 256>}, {transform_indices = @transform_1, window_bounds = array<i64: 1, 32, 1>}, {transform_indices = @transform_2, window_bounds = array<i64: 1, 32, 1>}, {pipeline_mode = #tpu.pipeline_mode<synchronous>, transform_indices = @transform_3, window_bounds = array<i64: 9, 256>}, {pipeline_mode = #tpu.pipeline_mode<synchronous>, transform_indices = @transform_4, window_bounds = array<i64: 9, 4, 32>}, {pipeline_mode = #tpu.pipeline_mode<synchronous>, transform_indices = @transform_5, window_bounds = array<i64: 4, 1>}, {transform_indices = @transform_6, window_bounds = array<i64: 1, 4, 256>}]} {
    %c0 = arith.constant 0 : index
    %c0_0 = arith.constant 0 : index
    %c0_1 = arith.constant 0 : index
    %0 = vector.load %arg1[%c0, %c0_0, %c0_1] : memref<1x32x256xbf16, #tpu.memory_space<vmem>>, vector<1x32x256xbf16>
    %1 = vector.shape_cast %0 : vector<1x32x256xbf16> to vector<32x256xbf16>
    %2 = arith.extf %1 : vector<32x256xbf16> to vector<32x256xf32>
    %c0_2 = arith.constant 0 : index
    %c0_3 = arith.constant 0 : index
    %c0_4 = arith.constant 0 : index
    %3 = vector.load %arg2[%c0_2, %c0_3, %c0_4] : memref<1x32x1xf32, #tpu.memory_space<vmem>>, vector<1x32x1xf32>
    %4 = vector.shape_cast %3 : vector<1x32x1xf32> to vector<32x1xf32>
    %5 = vector.broadcast %4 : vector<32x1xf32> to vector<32x256xf32>
    %6 = arith.mulf %2, %5 : vector<32x256xf32>
    %c0_5 = arith.constant 0 : index
    %c0_6 = arith.constant 0 : index
    %c0_7 = arith.constant 0 : index
    %7 = vector.load %arg3[%c0_5, %c0_6, %c0_7] : memref<1x32x1xf32, #tpu.memory_space<vmem>>, vector<1x32x1xf32>
    %8 = vector.shape_cast %7 : vector<1x32x1xf32> to vector<32x1xf32>
    %9 = vector.broadcast %8 : vector<32x1xf32> to vector<32x256xf32>
    %10 = arith.addf %6, %9 : vector<32x256xf32>
    %cst = arith.constant 5.000000e-01 : f32
    %11 = vector.broadcast %cst : f32 to vector<32x256xf32>
    %12 = arith.mulf %11, %10 : vector<32x256xf32>
    %cst_8 = arith.constant 0.707106769 : f32
    %13 = vector.broadcast %cst_8 : f32 to vector<32x256xf32>
    %14 = arith.mulf %10, %13 : vector<32x256xf32>
    %cst_9 = arith.constant 0.000000e+00 : f32
    %15 = vector.broadcast %cst_9 : f32 to vector<32x256xf32>
    %16 = arith.cmpf oge, %14, %15 : vector<32x256xf32>
    %cst_10 = arith.constant 1.000000e+00 : f32
    %cst_11 = arith.constant -1.000000e+00 : f32
    %17 = vector.broadcast %cst_10 : f32 to vector<32x256xf32>
    %18 = vector.broadcast %cst_11 : f32 to vector<32x256xf32>
    %19 = arith.select %16, %17, %18 : vector<32x256xi1>, vector<32x256xf32>
    %20 = math.absf %14 : vector<32x256xf32>
    %cst_12 = arith.constant 0.327591091 : f32
    %21 = vector.broadcast %cst_12 : f32 to vector<32x256xf32>
    %22 = arith.mulf %21, %20 : vector<32x256xf32>
    %cst_13 = arith.constant 1.000000e+00 : f32
    %23 = vector.broadcast %cst_13 : f32 to vector<32x256xf32>
    %24 = arith.addf %23, %22 : vector<32x256xf32>
    %25 = tpu.reciprocal %24 {approx = true} : vector<32x256xf32> -> vector<32x256xf32>
    %cst_14 = arith.constant 1.06140542 : f32
    %26 = vector.broadcast %cst_14 : f32 to vector<32x256xf32>
    %27 = arith.mulf %26, %25 : vector<32x256xf32>
    %cst_15 = arith.constant -1.45315206 : f32
    %28 = vector.broadcast %cst_15 : f32 to vector<32x256xf32>
    %29 = arith.addf %27, %28 : vector<32x256xf32>
    %30 = arith.mulf %29, %25 : vector<32x256xf32>
    %cst_16 = arith.constant 1.42141378 : f32
    %31 = vector.broadcast %cst_16 : f32 to vector<32x256xf32>
    %32 = arith.addf %30, %31 : vector<32x256xf32>
    %33 = arith.mulf %32, %25 : vector<32x256xf32>
    %cst_17 = arith.constant -0.284496725 : f32
    %34 = vector.broadcast %cst_17 : f32 to vector<32x256xf32>
    %35 = arith.addf %33, %34 : vector<32x256xf32>
    %36 = arith.mulf %35, %25 : vector<32x256xf32>
    %cst_18 = arith.constant 0.254829586 : f32
    %37 = vector.broadcast %cst_18 : f32 to vector<32x256xf32>
    %38 = arith.addf %36, %37 : vector<32x256xf32>
    %39 = arith.mulf %38, %25 : vector<32x256xf32>
    %cst_19 = arith.constant 0.000000e+00 : f32
    %40 = vector.broadcast %cst_19 : f32 to vector<32x256xf32>
    %41 = arith.subf %40, %20 : vector<32x256xf32>
    %42 = arith.mulf %41, %20 : vector<32x256xf32>
    %43 = math.exp %42 : vector<32x256xf32>
    %44 = arith.mulf %39, %43 : vector<32x256xf32>
    %cst_20 = arith.constant 1.000000e+00 : f32
    %45 = vector.broadcast %cst_20 : f32 to vector<32x256xf32>
    %46 = arith.subf %45, %44 : vector<32x256xf32>
    %47 = arith.mulf %19, %46 : vector<32x256xf32>
    %cst_21 = arith.constant 1.000000e+00 : f32
    %48 = vector.broadcast %cst_21 : f32 to vector<32x256xf32>
    %49 = arith.addf %48, %47 : vector<32x256xf32>
    %50 = arith.mulf %12, %49 : vector<32x256xf32>
    %51 = arith.truncf %50 : vector<32x256xf32> to vector<32x256xbf16>
    %c0_22 = arith.constant 0 : index
    %c0_23 = arith.constant 0 : index
    %52 = vector.load %arg4[%c0_22, %c0_23] : memref<9x256xf32, #tpu.memory_space<vmem>>, vector<9x256xf32>
    %cst_24 = arith.constant 0.000000e+00 : f32
    %53 = vector.broadcast %cst_24 : f32 to vector<4x256xf32>
    %c0_25 = arith.constant 0 : index
    %c0_26 = arith.constant 0 : index
    %c0_27 = arith.constant 0 : index
    %54 = vector.load %arg5[%c0_25, %c0_26, %c0_27] : memref<9x4x32xbf16, #tpu.memory_space<vmem>>, vector<1x4x32xbf16>
    %55 = vector.shape_cast %54 : vector<1x4x32xbf16> to vector<4x32xbf16>
    %cst_28 = arith.constant dense<0.000000e+00> : vector<4x256xf32>
    %56 = tpu.matmul %55, %51, %cst_28 {dimension_numbers = #tpu.dot_dimension_numbers<[1], [0], [0], [1], [0, 0, 1, 1], [], []>} : vector<4x32xbf16>, vector<32x256xbf16>, vector<4x256xf32> -> vector<4x256xf32>
    %c17_i32 = arith.constant 17 : i32
    %57 = tpu.dynamic_rotate %56 by %c17_i32 dim 1 : vector<4x256xf32>, i32 -> vector<4x256xf32>
    %58 = vector.extract_strided_slice %52 {offsets = [0, 0], sizes = [1, 256], strides = [1, 1]} : vector<9x256xf32> to vector<1x256xf32>
    %59 = vector.broadcast %58 : vector<1x256xf32> to vector<4x256xf32>
    %60 = arith.mulf %57, %59 : vector<4x256xf32>
    %61 = arith.addf %53, %60 : vector<4x256xf32>
    %c1 = arith.constant 1 : index
    %c0_29 = arith.constant 0 : index
    %c0_30 = arith.constant 0 : index
    %62 = vector.load %arg5[%c1, %c0_29, %c0_30] : memref<9x4x32xbf16, #tpu.memory_space<vmem>>, vector<1x4x32xbf16>
    %63 = vector.shape_cast %62 : vector<1x4x32xbf16> to vector<4x32xbf16>
    %cst_31 = arith.constant dense<0.000000e+00> : vector<4x256xf32>
    %64 = tpu.matmul %63, %51, %cst_31 {dimension_numbers = #tpu.dot_dimension_numbers<[1], [0], [0], [1], [0, 0, 1, 1], [], []>} : vector<4x32xbf16>, vector<32x256xbf16>, vector<4x256xf32> -> vector<4x256xf32>
    %c16_i32 = arith.constant 16 : i32
    %65 = tpu.dynamic_rotate %64 by %c16_i32 dim 1 : vector<4x256xf32>, i32 -> vector<4x256xf32>
    %66 = vector.extract_strided_slice %52 {offsets = [1, 0], sizes = [1, 256], strides = [1, 1]} : vector<9x256xf32> to vector<1x256xf32>
    %67 = vector.broadcast %66 : vector<1x256xf32> to vector<4x256xf32>
    %68 = arith.mulf %65, %67 : vector<4x256xf32>
    %69 = arith.addf %61, %68 : vector<4x256xf32>
    %c2 = arith.constant 2 : index
    %c0_32 = arith.constant 0 : index
    %c0_33 = arith.constant 0 : index
    %70 = vector.load %arg5[%c2, %c0_32, %c0_33] : memref<9x4x32xbf16, #tpu.memory_space<vmem>>, vector<1x4x32xbf16>
    %71 = vector.shape_cast %70 : vector<1x4x32xbf16> to vector<4x32xbf16>
    %cst_34 = arith.constant dense<0.000000e+00> : vector<4x256xf32>
    %72 = tpu.matmul %71, %51, %cst_34 {dimension_numbers = #tpu.dot_dimension_numbers<[1], [0], [0], [1], [0, 0, 1, 1], [], []>} : vector<4x32xbf16>, vector<32x256xbf16>, vector<4x256xf32> -> vector<4x256xf32>
    %c15_i32 = arith.constant 15 : i32
    %73 = tpu.dynamic_rotate %72 by %c15_i32 dim 1 : vector<4x256xf32>, i32 -> vector<4x256xf32>
    %74 = vector.extract_strided_slice %52 {offsets = [2, 0], sizes = [1, 256], strides = [1, 1]} : vector<9x256xf32> to vector<1x256xf32>
    %75 = vector.broadcast %74 : vector<1x256xf32> to vector<4x256xf32>
    %76 = arith.mulf %73, %75 : vector<4x256xf32>
    %77 = arith.addf %69, %76 : vector<4x256xf32>
    %c3 = arith.constant 3 : index
    %c0_35 = arith.constant 0 : index
    %c0_36 = arith.constant 0 : index
    %78 = vector.load %arg5[%c3, %c0_35, %c0_36] : memref<9x4x32xbf16, #tpu.memory_space<vmem>>, vector<1x4x32xbf16>
    %79 = vector.shape_cast %78 : vector<1x4x32xbf16> to vector<4x32xbf16>
    %cst_37 = arith.constant dense<0.000000e+00> : vector<4x256xf32>
    %80 = tpu.matmul %79, %51, %cst_37 {dimension_numbers = #tpu.dot_dimension_numbers<[1], [0], [0], [1], [0, 0, 1, 1], [], []>} : vector<4x32xbf16>, vector<32x256xbf16>, vector<4x256xf32> -> vector<4x256xf32>
    %c1_i32 = arith.constant 1 : i32
    %81 = tpu.dynamic_rotate %80 by %c1_i32 dim 1 : vector<4x256xf32>, i32 -> vector<4x256xf32>
    %82 = vector.extract_strided_slice %52 {offsets = [3, 0], sizes = [1, 256], strides = [1, 1]} : vector<9x256xf32> to vector<1x256xf32>
    %83 = vector.broadcast %82 : vector<1x256xf32> to vector<4x256xf32>
    %84 = arith.mulf %81, %83 : vector<4x256xf32>
    %85 = arith.addf %77, %84 : vector<4x256xf32>
    %c4 = arith.constant 4 : index
    %c0_38 = arith.constant 0 : index
    %c0_39 = arith.constant 0 : index
    %86 = vector.load %arg5[%c4, %c0_38, %c0_39] : memref<9x4x32xbf16, #tpu.memory_space<vmem>>, vector<1x4x32xbf16>
    %87 = vector.shape_cast %86 : vector<1x4x32xbf16> to vector<4x32xbf16>
    %cst_40 = arith.constant dense<0.000000e+00> : vector<4x256xf32>
    %88 = tpu.matmul %87, %51, %cst_40 {dimension_numbers = #tpu.dot_dimension_numbers<[1], [0], [0], [1], [0, 0, 1, 1], [], []>} : vector<4x32xbf16>, vector<32x256xbf16>, vector<4x256xf32> -> vector<4x256xf32>
    %89 = arith.addf %85, %88 : vector<4x256xf32>
    %c5 = arith.constant 5 : index
    %c0_41 = arith.constant 0 : index
    %c0_42 = arith.constant 0 : index
    %90 = vector.load %arg5[%c5, %c0_41, %c0_42] : memref<9x4x32xbf16, #tpu.memory_space<vmem>>, vector<1x4x32xbf16>
    %91 = vector.shape_cast %90 : vector<1x4x32xbf16> to vector<4x32xbf16>
    %cst_43 = arith.constant dense<0.000000e+00> : vector<4x256xf32>
    %92 = tpu.matmul %91, %51, %cst_43 {dimension_numbers = #tpu.dot_dimension_numbers<[1], [0], [0], [1], [0, 0, 1, 1], [], []>} : vector<4x32xbf16>, vector<32x256xbf16>, vector<4x256xf32> -> vector<4x256xf32>
    %c255_i32 = arith.constant 255 : i32
    %93 = tpu.dynamic_rotate %92 by %c255_i32 dim 1 : vector<4x256xf32>, i32 -> vector<4x256xf32>
    %94 = vector.extract_strided_slice %52 {offsets = [5, 0], sizes = [1, 256], strides = [1, 1]} : vector<9x256xf32> to vector<1x256xf32>
    %95 = vector.broadcast %94 : vector<1x256xf32> to vector<4x256xf32>
    %96 = arith.mulf %93, %95 : vector<4x256xf32>
    %97 = arith.addf %89, %96 : vector<4x256xf32>
    %c6 = arith.constant 6 : index
    %c0_44 = arith.constant 0 : index
    %c0_45 = arith.constant 0 : index
    %98 = vector.load %arg5[%c6, %c0_44, %c0_45] : memref<9x4x32xbf16, #tpu.memory_space<vmem>>, vector<1x4x32xbf16>
    %99 = vector.shape_cast %98 : vector<1x4x32xbf16> to vector<4x32xbf16>
    %cst_46 = arith.constant dense<0.000000e+00> : vector<4x256xf32>
    %100 = tpu.matmul %99, %51, %cst_46 {dimension_numbers = #tpu.dot_dimension_numbers<[1], [0], [0], [1], [0, 0, 1, 1], [], []>} : vector<4x32xbf16>, vector<32x256xbf16>, vector<4x256xf32> -> vector<4x256xf32>
    %c241_i32 = arith.constant 241 : i32
    %101 = tpu.dynamic_rotate %100 by %c241_i32 dim 1 : vector<4x256xf32>, i32 -> vector<4x256xf32>
    %102 = vector.extract_strided_slice %52 {offsets = [6, 0], sizes = [1, 256], strides = [1, 1]} : vector<9x256xf32> to vector<1x256xf32>
    %103 = vector.broadcast %102 : vector<1x256xf32> to vector<4x256xf32>
    %104 = arith.mulf %101, %103 : vector<4x256xf32>
    %105 = arith.addf %97, %104 : vector<4x256xf32>
    %c7 = arith.constant 7 : index
    %c0_47 = arith.constant 0 : index
    %c0_48 = arith.constant 0 : index
    %106 = vector.load %arg5[%c7, %c0_47, %c0_48] : memref<9x4x32xbf16, #tpu.memory_space<vmem>>, vector<1x4x32xbf16>
    %107 = vector.shape_cast %106 : vector<1x4x32xbf16> to vector<4x32xbf16>
    %cst_49 = arith.constant dense<0.000000e+00> : vector<4x256xf32>
    %108 = tpu.matmul %107, %51, %cst_49 {dimension_numbers = #tpu.dot_dimension_numbers<[1], [0], [0], [1], [0, 0, 1, 1], [], []>} : vector<4x32xbf16>, vector<32x256xbf16>, vector<4x256xf32> -> vector<4x256xf32>
    %c240_i32 = arith.constant 240 : i32
    %109 = tpu.dynamic_rotate %108 by %c240_i32 dim 1 : vector<4x256xf32>, i32 -> vector<4x256xf32>
    %110 = vector.extract_strided_slice %52 {offsets = [7, 0], sizes = [1, 256], strides = [1, 1]} : vector<9x256xf32> to vector<1x256xf32>
    %111 = vector.broadcast %110 : vector<1x256xf32> to vector<4x256xf32>
    %112 = arith.mulf %109, %111 : vector<4x256xf32>
    %113 = arith.addf %105, %112 : vector<4x256xf32>
    %c8 = arith.constant 8 : index
    %c0_50 = arith.constant 0 : index
    %c0_51 = arith.constant 0 : index
    %114 = vector.load %arg5[%c8, %c0_50, %c0_51] : memref<9x4x32xbf16, #tpu.memory_space<vmem>>, vector<1x4x32xbf16>
    %115 = vector.shape_cast %114 : vector<1x4x32xbf16> to vector<4x32xbf16>
    %cst_52 = arith.constant dense<0.000000e+00> : vector<4x256xf32>
    %116 = tpu.matmul %115, %51, %cst_52 {dimension_numbers = #tpu.dot_dimension_numbers<[1], [0], [0], [1], [0, 0, 1, 1], [], []>} : vector<4x32xbf16>, vector<32x256xbf16>, vector<4x256xf32> -> vector<4x256xf32>
    %c239_i32 = arith.constant 239 : i32
    %117 = tpu.dynamic_rotate %116 by %c239_i32 dim 1 : vector<4x256xf32>, i32 -> vector<4x256xf32>
    %118 = vector.extract_strided_slice %52 {offsets = [8, 0], sizes = [1, 256], strides = [1, 1]} : vector<9x256xf32> to vector<1x256xf32>
    %119 = vector.broadcast %118 : vector<1x256xf32> to vector<4x256xf32>
    %120 = arith.mulf %117, %119 : vector<4x256xf32>
    %121 = arith.addf %113, %120 : vector<4x256xf32>
    %c0_53 = arith.constant 0 : index
    %c0_54 = arith.constant 0 : index
    %122 = vector.load %arg6[%c0_53, %c0_54] : memref<4x1xf32, #tpu.memory_space<vmem>>, vector<4x1xf32>
    %123 = vector.broadcast %122 : vector<4x1xf32> to vector<4x256xf32>
    %124 = arith.addf %121, %123 : vector<4x256xf32>
    %c0_55 = arith.constant 0 : index
    %c0_56 = arith.constant 0 : index
    %c0_57 = arith.constant 0 : index
    %125 = vector.load %arg7[%c0_55, %c0_56, %c0_57] : memref<1x4x256xf32, #tpu.memory_space<vmem>>, vector<1x4x256xf32>
    %126 = vector.shape_cast %125 : vector<1x4x256xf32> to vector<4x256xf32>
    %127 = vector.shape_cast %124 : vector<4x256xf32> to vector<1x4x256xf32>
    tpu.vector_store %arg7[%c0_55, %c0_56, %c0_57], %127 {strides = array<i32>} : memref<1x4x256xf32, #tpu.memory_space<vmem>>, vector<1x4x256xf32>,
    return
  }
  func.func @transform_0(%arg0: i32) -> (i32, i32, i32) {
    %c0_i32 = arith.constant 0 : i32
    %c0_i32_0 = arith.constant 0 : i32
    %c0_i32_1 = arith.constant 0 : i32
    return %arg0, %c0_i32, %c0_i32_0 : i32, i32, i32
  }
  func.func @transform_1(%arg0: i32) -> (i32, i32, i32) {
    %c0_i32 = arith.constant 0 : i32
    %c0_i32_0 = arith.constant 0 : i32
    %c0_i32_1 = arith.constant 0 : i32
    return %arg0, %c0_i32, %c0_i32_0 : i32, i32, i32
  }
  func.func @transform_2(%arg0: i32) -> (i32, i32, i32) {
    %c0_i32 = arith.constant 0 : i32
    %c0_i32_0 = arith.constant 0 : i32
    %c0_i32_1 = arith.constant 0 : i32
    return %arg0, %c0_i32, %c0_i32_0 : i32, i32, i32
  }
  func.func @transform_3(%arg0: i32) -> (i32, i32) {
    %c0_i32 = arith.constant 0 : i32
    %c0_i32_0 = arith.constant 0 : i32
    %c0_i32_1 = arith.constant 0 : i32
    return %c0_i32, %c0_i32_0 : i32, i32
  }
  func.func @transform_4(%arg0: i32) -> (i32, i32, i32) {
    %c0_i32 = arith.constant 0 : i32
    %c0_i32_0 = arith.constant 0 : i32
    %c0_i32_1 = arith.constant 0 : i32
    %c0_i32_2 = arith.constant 0 : i32
    return %c0_i32, %c0_i32_0, %c0_i32_1 : i32, i32, i32
  }
  func.func @transform_5(%arg0: i32) -> (i32, i32) {
    %c0_i32 = arith.constant 0 : i32
    %c0_i32_0 = arith.constant 0 : i32
    %c0_i32_1 = arith.constant 0 : i32
    return %c0_i32, %c0_i32_0 : i32, i32
  }
  func.func @transform_6(%arg0: i32) -> (i32, i32, i32) {
    %c0_i32 = arith.constant 0 : i32
    %c0_i32_0 = arith.constant 0 : i32
    %c0_i32_1 = arith.constant 0 : i32
    return %arg0, %c0_i32, %c0_i32_0 : i32, i32, i32
  }
}

</mosaic_0001>

<bundles_post_ra>
// kernel: mask_withtime_forward.2
= control target key start
LH: loop header
LB: loop body
LE: loop exit
PB: predicated region body
PF: predicated region fallthrough
CT: control target
= control target key end

     0   :  { %s767_s18 = smov 0   ;;  %s843_s0 = inlined_call_operand.vmem [shape: bf16[2,128,256], index: 0, kind: input, shape index: {}]   ;;  %s844_s1 = inlined_call_operand.vmem [shape: bf16[32,128], index: 1, kind: input, shape index: {}]   ;;  %s845_s2 = inlined_call_operand.vmem [shape: f32[32,1], index: 2, kind: input, shape index: {}]   ;;  %s846_s3 = inlined_call_operand.vmem [shape: bf16[2,32,256], index: 3, kind: output, shape index: {0}]   ;;  %s847_s4 = inlined_call_operand.vmem [shape: f32[2,32,1], index: 4, kind: output, shape index: {1}]   ;;  %s848_s5 = inlined_call_operand.vmem [shape: f32[2,32,1], index: 5, kind: output, shape index: {2}]  }
   0x1 LB: > { %s630_s19 = sadd.s32 4294967295, %s734_s18   ;;  %p634_p0 = scmp.ge.s32.totalorder %s734_s18, 1  ;;  %s734_s18 = sphi %s767_s18, %s16_s18  }
   0x2   : > { %p192_p1 = scmp.lt.s32.totalorder %s734_s18, 3 }
   0x4   : > { %p193_p2 = pnand %p634_p0, %p192_p1 }
   0x5   : > { %p230_p3 = scmp.lt.s32.totalorder (!%p193_p2), %s630_s19, 1 }
   0x6   : > { %196 = sbr.rel (%p193_p2) target bundleno = 401 (0x191), region = 32 }
   0xb   : > { %v736_v0 = vmov 0   ;;  %s850_s19 = smov (!%p230_p3, %s630_s19), 1  ;;  %v271_v1 = vld [vmem:[%s845_s2] sm:$0xff]  ;;  %v273_v2 = vld [vmem:[%s845_s2 + $0x10] sm:$0xff]  ;;  %v272_v3 = vld [vmem:[%s845_s2 + $0x8] sm:$0xff]  ;;  %vm452_vm0 = vcmask 7168  }
   0xc   : > { %419 = vmatprep.mubr.bf16.mxu0 %v736_v0  ;;  %429 = vmatprep.mubr.bf16.mxu1 %v736_v0  ;;  %s667_s24 = sshll.u32 %s850_s19, 7  ;;  %v274_v4 = vld [vmem:[%s845_s2 + $0x18] sm:$0xff]  ;;  %v726_v21 = vld [vmem:[%s844_s1] sm:$0xff]   ;;  %v727_v22 = vld [vmem:[%s844_s1 + $0x8] sm:$0xff]   ;;  %s818_s11 = sshll.u32 %s850_s19, 5 }
   0xd   : > { %700 = vset.pattern.permute.xlu0 %v736_v0  ;;  %701 = vset.pattern.permute.xlu1 %v736_v0  ;;  %s793_s6 = scalar_lea.vmem %s843_s0, %s667_s24  ;;  %s239_s14 = scalar_lea.vmem %s846_s3, %s818_s11 }
   0xe   : > { %277 = vperm.xlu0 %700, %v271_v1   ;;  %287 = vperm.xlu1 %701, %v273_v2   ;;  %v702_v5 = vld [vmem:[%s793_s6 + $0x74] ss:$8 sps:$4 sm:$0xff]   ;;  %v704_v6 = vld [vmem:[%s793_s6 + $0x70] ss:$8 sps:$4 sm:$0xff]   ;;  %v705_v7 = vld [vmem:[%s793_s6 + $0x64] ss:$8 sps:$4 sm:$0xff]   ;;  %s244_s17 = scalar_lea.vmem %s847_s4, %s818_s11  ;;  %s249_s21 = scalar_lea.vmem %s848_s5, %s818_s11 }
   0xf   : > { %387 = vmatprep.subr.bf16.mxu0 %v702_v5  ;;  %675 = vmatprep.subr.bf16.mxu1 %v702_v5  ;;  %v707_v8 = vld [vmem:[%s793_s6 + $0x60] ss:$8 sps:$4 sm:$0xff]   ;;  %v708_v9 = vld [vmem:[%s793_s6 + $0x54] ss:$8 sps:$4 sm:$0xff]   ;;  %v710_v10 = vld [vmem:[%s793_s6 + $0x50] ss:$8 sps:$4 sm:$0xff]  }
  0x10   : > { %388 = vmatpush1.bf16.msra.mxu0 %v704_v6  ;;  %683 = vmatpush1.bf16.msra.mxu1 %v704_v6  ;;  %v711_v11 = vld [vmem:[%s793_s6 + $0x44] ss:$8 sps:$4 sm:$0xff]   ;;  %v713_v12 = vld [vmem:[%s793_s6 + $0x40] ss:$8 sps:$4 sm:$0xff]   ;;  %v714_v13 = vld [vmem:[%s793_s6 + $0x34] ss:$8 sps:$4 sm:$0xff]  }
  0x11   : > { %389 = vmatprep.subr.bf16.mxu0 %v705_v7  ;;  %676 = vmatprep.subr.bf16.mxu1 %v705_v7  ;;  %v716_v14 = vld [vmem:[%s793_s6 + $0x30] ss:$8 sps:$4 sm:$0xff]   ;;  %v717_v15 = vld [vmem:[%s793_s6 + $0x24] ss:$8 sps:$4 sm:$0xff]   ;;  %v719_v16 = vld [vmem:[%s793_s6 + $0x20] ss:$8 sps:$4 sm:$0xff]  }
  0x12   : > { %282 = vperm.xlu0 %700, %v272_v3   ;;  %292 = vperm.xlu1 %701, %v274_v4   ;;  %v720_v17 = vld [vmem:[%s793_s6 + $0x14] ss:$8 sps:$4 sm:$0xff]   ;;  %v722_v18 = vld [vmem:[%s793_s6 + $0x10] ss:$8 sps:$4 sm:$0xff]   ;;  %v723_v19 = vld [vmem:[%s793_s6 + $0x4] ss:$8 sps:$4 sm:$0xff]  }
  0x13   : > { %v725_v20 = vld [vmem:[%s793_s6] ss:$8 sps:$4 sm:$0xff]  }
  0x14   : > { %390 = vmatpush1.bf16.msra.mxu0 %v707_v8  ;;  %684 = vmatpush1.bf16.msra.mxu1 %v707_v8 }
  0x15   : > { %391 = vmatprep.subr.bf16.mxu0 %v708_v9  ;;  %677 = vmatprep.subr.bf16.mxu1 %v708_v9 }
  0x18   : > { %392 = vmatpush1.bf16.msra.mxu0 %v710_v10  ;;  %685 = vmatpush1.bf16.msra.mxu1 %v710_v10 }
  0x19   : > { %393 = vmatprep.subr.bf16.mxu0 %v711_v11  ;;  %678 = vmatprep.subr.bf16.mxu1 %v711_v11 }
  0x1c   : > { %394 = vmatpush1.bf16.msra.mxu0 %v713_v12  ;;  %686 = vmatpush1.bf16.msra.mxu1 %v713_v12 }
  0x1d   : > { %395 = vmatprep.subr.bf16.mxu0 %v714_v13  ;;  %679 = vmatprep.subr.bf16.mxu1 %v714_v13 }
  0x20   : > { %396 = vmatpush1.bf16.msra.mxu0 %v716_v14  ;;  %687 = vmatpush1.bf16.msra.mxu1 %v716_v14 }
  0x21   : > { %397 = vmatprep.subr.bf16.mxu0 %v717_v15  ;;  %680 = vmatprep.subr.bf16.mxu1 %v717_v15 }
  0x24   : > { %398 = vmatpush1.bf16.msra.mxu0 %v719_v16  ;;  %688 = vmatpush1.bf16.msra.mxu1 %v719_v16 }
  0x25   : > { %399 = vmatprep.subr.bf16.mxu0 %v720_v17  ;;  %681 = vmatprep.subr.bf16.mxu1 %v720_v17 }
  0x28   : > { %400 = vmatpush1.bf16.msra.mxu0 %v722_v18  ;;  %689 = vmatpush1.bf16.msra.mxu1 %v722_v18 }
  0x29   : > { %401 = vmatprep.subr.bf16.mxu0 %v723_v19  ;;  %682 = vmatprep.subr.bf16.mxu1 %v723_v19 }
  0x2c   : > { %402 = vmatpush1.bf16.msra.mxu0 %v725_v20  ;;  %690 = vmatpush1.bf16.msra.mxu1 %v725_v20 }
  0x2f   : > { %420 = vmatmul.mubr.bf16.vlgmr.msra.gmra.mxu0 %v726_v21  ;;  %430 = vmatmul.mubr.bf16.vlgmr.msra.gmra.mxu1 %v727_v22 }
  0x89   : > { %v288_v23 = vpop.permute.xlu1 %287  ;;  %v278_v24 = vpop.permute.xlu0 %277 }
  0x8d   : > { %v293_v33 = vpop.permute.xlu1 %292  ;;  %v283_v36 = vpop.permute.xlu0 %282 }
  0xef   : > { %v421_v25 = vpop.f32.mrf.mxu0  ;;  %v431_v26 = vpop.f32.mrf.mxu1 }
  0xf0   : > { %v432_v27 = vadd.f32 %v431_v26, %v288_v23  ;;  %v422_v28 = vadd.f32 %v421_v25, %v278_v24 }
  0xf1   : > { %v423_v29 = vpop.f32.mrf.mxu0  ;;  %v433_v30 = vpop.f32.mrf.mxu1 }
  0xf2   : > { %v424_v31 = vadd.f32 %v423_v29, %v278_v24  ;;  %v434_v32 = vadd.f32 %v433_v30, %v288_v23  ;;  %v457_v42 = vmul.f32 %v422_v28, %v422_v28  ;;  %v461_v53 = vmul.f32 %v432_v27, %v432_v27 }
  0xf3   : > { %v425_v34 = vpop.f32.mrf.mxu0  ;;  %v435_v35 = vpop.f32.mrf.mxu1 }
  0xf4   : > { %v671_v37 = vpack.c.bf16 %v424_v31, %v422_v28  ;;  %v673_v38 = vpack.c.bf16 %v434_v32, %v432_v27  ;;  %v440_v41 = vadd.f32 %v424_v31, %v422_v28  ;;  %v458_v43 = vmul.f32 %v424_v31, %v424_v31 }
  0xf5   : > { %v427_v39 = vpop.f32.mrf.mxu0  ;;  %v437_v40 = vpop.f32.mrf.mxu1  ;;  %v426_v44 = vadd.f32 %v425_v34, %v283_v36  ;;  %v436_v45 = vadd.f32 %v435_v35, %v293_v33  ;;  %v446_v51 = vadd.f32 %v434_v32, %v432_v27  ;;  %v462_v54 = vmul.f32 %v434_v32, %v434_v32 }
  0xf6   : > { %505 = vst [vmem:[%s239_s14] sm:$0xff] %v671_v37  ;;  %507 = vst [vmem:[%s239_s14 + $0x10] sm:$0xff] %v673_v38  ;;  %v428_v46 = vadd.f32 %v427_v39, %v283_v36  ;;  %v438_v47 = vadd.f32 %v437_v40, %v293_v33  ;;  %441 = vadd.xlane.f32.xlu0 %v440_v41  ;;  %v465_v48 = vadd.f32 %v458_v43, %v457_v42 }
  0xf7   : > { %v471_v57 = vadd.f32 %v462_v54, %v461_v53  ;;  %v459_v58 = vmul.f32 %v426_v44, %v426_v44  ;;  %v463_v61 = vmul.f32 %v436_v45, %v436_v45 }
  0xf8   : > { %v672_v49 = vpack.c.bf16 %v428_v46, %v426_v44  ;;  %v674_v50 = vpack.c.bf16 %v438_v47, %v436_v45  ;;  %466 = vadd.xlane.f32.xlu1 %v465_v48  ;;  %v443_v52 = vadd.f32 %v428_v46, %v426_v44  ;;  %v449_v55 = vadd.f32 %v438_v47, %v436_v45 }
  0xf9   : > { %v460_v56 = vmul.f32 %v428_v46, %v428_v46  ;;  %v464_v60 = vmul.f32 %v438_v47, %v438_v47 }
  0xfa   : > { %506 = vst [vmem:[%s239_s14 + $0x8] sm:$0xff] %v672_v49  ;;  %508 = vst [vmem:[%s239_s14 + $0x18] sm:$0xff] %v674_v50  ;;  %447 = vadd.xlane.f32.xlu0 %v446_v51 }
  0xfb   : > { %v468_v59 = vadd.f32 %v460_v56, %v459_v58  ;;  %v474_v62 = vadd.f32 %v464_v60, %v463_v61 }
  0xfc   : > { %444 = vadd.xlane.f32.xlu1 %v443_v52 }
  0xfe   : > { %450 = vadd.xlane.f32.xlu0 %v449_v55 }
 0x100   : > { %472 = vadd.xlane.f32.xlu1 %v471_v57 }
 0x102   : > { %469 = vadd.xlane.f32.xlu0 %v468_v59 }
 0x106   : > { %475 = vadd.xlane.f32.xlu0 %v474_v62 }
 0x17f   : > { %v442_v63 = vpop.xlane.xlu0 %441 }
 0x180   : > { %453 = vst.msk [vmem:[%s244_s17] sm:$0xff] %vm452_vm0, %v442_v63 }
 0x181   : > { %v467_v0 = vpop.xlane.xlu1 %466 }
 0x182   : > { %477 = vst.msk [vmem:[%s249_s21] sm:$0xff] %vm452_vm0, %v467_v0 }
 0x183   : > { %v448_v1 = vpop.xlane.xlu0 %447 }
 0x184   : > { %455 = vst.msk [vmem:[%s244_s17 + $0x10] sm:$0xff] %vm452_vm0, %v448_v1 }
 0x185   : > { %v445_v2 = vpop.xlane.xlu1 %444 }
 0x186   : > { %454 = vst.msk [vmem:[%s244_s17 + $0x8] sm:$0xff] %vm452_vm0, %v445_v2 }
 0x187   : > { %v451_v3 = vpop.xlane.xlu0 %450 }
 0x188   : > { %456 = vst.msk [vmem:[%s244_s17 + $0x18] sm:$0xff] %vm452_vm0, %v451_v3 }
 0x189   : > { %v473_v4 = vpop.xlane.xlu1 %472 }
 0x18a   : > { %479 = vst.msk [vmem:[%s249_s21 + $0x10] sm:$0xff] %vm452_vm0, %v473_v4 }
 0x18b   : > { %v470_v5 = vpop.xlane.xlu0 %469 }
 0x18c   : > { %478 = vst.msk [vmem:[%s249_s21 + $0x8] sm:$0xff] %vm452_vm0, %v470_v5 }
 0x18f   : > { %v476_v6 = vpop.xlane.xlu0 %475 }
 0x190   : > { %480 = vst.msk [vmem:[%s249_s21 + $0x18] sm:$0xff] %vm452_vm0, %v476_v6 }
 0x191 PF: > { %s16_s18 = sadd.s32 1, %s734_s18  }
 0x192   : > { %p13_p4 = scmp.ge.s32.totalorder %s16_s18, 4  }
 0x194   :  { %15 = sbr.rel (!%p13_p4) target bundleno = 1 (0x1), region = 86 }

// kernel: mask_withtime_forward.3
= control target key start
LH: loop header
LB: loop body
LE: loop exit
PB: predicated region body
PF: predicated region fallthrough
CT: control target
= control target key end

     0   :  { %s1390_s21 = smov 0   ;;  %s1664_s0 = inlined_call_operand.vmem [shape: bf16[2,32,256], index: 0, kind: input, shape index: {}]   ;;  %s1665_s1 = inlined_call_operand.vmem [shape: f32[2,32,1], index: 1, kind: input, shape index: {}]   ;;  %s1666_s2 = inlined_call_operand.vmem [shape: f32[2,32,1], index: 2, kind: input, shape index: {}]   ;;  %s1667_s3 = inlined_call_operand.vmem [shape: f32[9,256], index: 3, kind: input, shape index: {}]   ;;  %s1668_s4 = inlined_call_operand.vmem [shape: bf16[9,4,32], index: 4, kind: input, shape index: {}]   ;;  %s1669_s5 = inlined_call_operand.vmem [shape: f32[4,1], index: 5, kind: input, shape index: {}]   ;;  %s1670_s6 = inlined_call_operand.vmem [shape: f32[2,4,256], index: 6, kind: output, shape index: {}]  }
   0x1 LB: > { %s1247_s22 = sadd.s32 4294967295, %s1343_s21   ;;  %p1251_p0 = scmp.ge.s32.totalorder %s1343_s21, 1  ;;  %s1343_s21 = sphi %s1390_s21, %s16_s21  }
   0x2   : > { %p232_p1 = scmp.lt.s32.totalorder %s1343_s21, 3 }
   0x4   : > { %p233_p2 = pnand %p1251_p0, %p232_p1 }
   0x5   : > { %p272_p3 = scmp.lt.s32.totalorder (!%p233_p2), %s1247_s22, 1  ;;  %s1348_s30 = smov (!%p233_p2), 16  }
   0x6   : > { %236 = sbr.rel (%p233_p2) target bundleno = 574 (0x23e), region = 44  ;;  %s1349_s7 = smov (!%p233_p2), 15  }
   0x7   : > { %s1351_s9 = smov (!%p233_p2), 127   ;;  %s1352_s10 = smov (!%p233_p2), 113  }
   0x8   : > { %s1353_s11 = smov (!%p233_p2), 112   ;;  %s1354_s12 = smov (!%p233_p2), 111  }
   0xb   : > { %v1345_v0 = vmov 0   ;;  %s1672_s22 = smov (!%p272_p3, %s1247_s22), 1  ;;  %vm586_vm8 = vcmask 261120  }
   0xc   : > { %1304 = vset.pattern.permute.xlu1 %v1345_v0  ;;  %1303 = vset.pattern.permute.xlu0 %v1345_v0  ;;  %s1281_s23 = sshll.u32 %s1672_s22, 5  ;;  %s1284_s25 = sshll.u32 %s1672_s22, 3 }
   0xd   : > { %622 = vmatprep.mubr.bf16.mxu0 %v1345_v0  ;;  %689 = vmatprep.mubr.bf16.mxu1 %v1345_v0  ;;  %s286_s26 = scalar_lea.vmem %s1666_s2, %s1281_s23  ;;  %s281_s29 = scalar_lea.vmem %s1665_s1, %s1281_s23 }
   0xe   : > { %v339_v1 = vld [vmem:[%s286_s26 + $0x10] sm:$0xff]  ;;  %v340_v3 = vld [vmem:[%s286_s26 + $0x18] sm:$0xff]  ;;  %v306_v5 = vld [vmem:[%s281_s29 + $0x8] sm:$0xff]  ;;  %s276_s8 = scalar_lea.vmem %s1664_s0, %s1281_s23  ;;  %s291_s28 = scalar_lea.vmem %s1670_s6, %s1284_s25 }
   0xf   : > { %v307_v2 = vld [vmem:[%s281_s29 + $0x10] sm:$0xff]  ;;  %353 = vperm.xlu1 %1304, %v339_v1   ;;  %v308_v4 = vld [vmem:[%s281_s29 + $0x18] sm:$0xff]  ;;  %v305_v6 = vld [vmem:[%s281_s29] sm:$0xff]  ;;  %s1347_s29 = smov 17  }
  0x10   : > { %321 = vperm.xlu0 %1303, %v307_v2   ;;  %v338_v7 = vld [vmem:[%s286_s26 + $0x8] sm:$0xff]  ;;  %v337_v8 = vld [vmem:[%s286_s26] sm:$0xff]  ;;  %v295_v9 = vld [vmem:[%s276_s8 + $0x10] sm:$0xff] }
  0x11   : > { %v301_v10 = vunpack.c.l.bf16 %v295_v9  ;;  %v302_v11 = vunpack.c.h.bf16 %v295_v9  ;;  %v296_v12 = vld [vmem:[%s276_s8 + $0x18] sm:$0xff]  ;;  %v294_v34 = vld [vmem:[%s276_s8 + $0x8] sm:$0xff]  ;;  %v293_v38 = vld [vmem:[%s276_s8] sm:$0xff]  ;;  %s1350_s8 = smov 1  }
  0x12   : > { %v303_v17 = vunpack.c.l.bf16 %v296_v12  ;;  %v304_v18 = vunpack.c.h.bf16 %v296_v12  ;;  %v299_v43 = vunpack.c.l.bf16 %v294_v34  ;;  %v300_v44 = vunpack.c.h.bf16 %v294_v34 }
  0x13   : > { %358 = vperm.xlu1 %1304, %v340_v3   ;;  %v297_v45 = vunpack.c.l.bf16 %v293_v38  ;;  %v298_v49 = vunpack.c.h.bf16 %v293_v38 }
  0x14   : > { %326 = vperm.xlu0 %1303, %v308_v4  }
  0x17   : > { %316 = vperm.xlu1 %1304, %v306_v5  }
  0x18   : > { %311 = vperm.xlu0 %1303, %v305_v6  }
  0x1b   : > { %348 = vperm.xlu1 %1304, %v338_v7  }
  0x1c   : > { %343 = vperm.xlu0 %1303, %v337_v8  }
  0x8a   : > { %v354_v13 = vpop.permute.xlu1 %353 }
  0x8b   : > { %v322_v14 = vpop.permute.xlu0 %321 }
  0x8c   : > { %v333_v15 = vmul.f32 %v322_v14, %v301_v10  ;;  %v334_v16 = vmul.f32 %v322_v14, %v302_v11 }
  0x8e   : > { %v365_v19 = vadd.f32 %v354_v13, %v333_v15  ;;  %v1414_v20 = vadd.f32 %v354_v13, %v334_v16  ;;  %v359_v21 = vpop.permute.xlu1 %358 }
  0x8f   : > { %v327_v22 = vpop.permute.xlu0 %326 }
  0x90   : > { %v1416_v23 = vmul.f32 0.70710677, %v365_v19  ;;  %v1419_v24 = vmul.f32 0.70710677, %v1414_v20  ;;  %v335_v25 = vmul.f32 %v327_v22, %v303_v17  ;;  %v336_v26 = vmul.f32 %v327_v22, %v304_v18 }
  0x91   : > { %v1460_v15 = vmul.f32 0.5, %v365_v19 }
  0x92   : > { %v405_v27 = vand.u32 2147483647, %v1416_v23  ;;  %v406_v28 = vand.u32 2147483647, %v1419_v24  ;;  %v1423_v29 = vadd.f32 %v359_v21, %v335_v25  ;;  %v1425_v30 = vadd.f32 %v359_v21, %v336_v26  ;;  %v317_v33 = vpop.permute.xlu1 %316 }
  0x93   : > { %v312_v37 = vpop.permute.xlu0 %311  ;;  %v331_v53 = vmul.f32 %v317_v33, %v299_v43  ;;  %v332_v54 = vmul.f32 %v317_v33, %v300_v44  ;;  %vm389_vm0 = vcmp.ge.f32.partialorder %v1416_v23, 0.0  ;;  %vm390_vm1 = vcmp.ge.f32.partialorder %v1419_v24, 0.0 }
  0x94   : > { %v413_v31 = vmul.f32 0.3275911, %v405_v27  ;;  %v414_v32 = vmul.f32 0.3275911, %v406_v28  ;;  %v1428_v35 = vmul.f32 0.70710677, %v1423_v29  ;;  %v329_v56 = vmul.f32 %v312_v37, %v297_v45 }
  0x95   : > { %v1431_v36 = vmul.f32 0.70710677, %v1425_v30  ;;  %v509_v48 = vsub.f32 0.0, %v405_v27  ;;  %v510_v57 = vsub.f32 0.0, %v406_v28  ;;  %v330_v61 = vmul.f32 %v312_v37, %v298_v49 }
  0x96   : > { %v421_v39 = vadd.f32 1.0, %v413_v31  ;;  %v422_v40 = vadd.f32 1.0, %v414_v32  ;;  %v407_v41 = vand.u32 2147483647, %v1428_v35  ;;  %v349_v50 = vpop.permute.xlu1 %348  ;;  %v1468_v32 = vmul.f32 0.5, %v1414_v20 }
  0x97   : > { %v408_v42 = vand.u32 2147483647, %v1431_v36  ;;  %v344_v55 = vpop.permute.xlu0 %343  ;;  %v1435_v58 = vadd.f32 %v349_v50, %v331_v53  ;;  %v1437_v59 = vadd.f32 %v349_v50, %v332_v54  ;;  %v517_v60 = vmul.f32 %v509_v48, %v405_v27 }
  0x98   : > { %1305 = vrcp.f32 %v421_v39  ;;  %v415_v46 = vmul.f32 0.3275911, %v407_v41  ;;  %v1439_v62 = vadd.f32 %v344_v55, %v329_v56  ;;  %v1447_v2 = vadd.f32 %v344_v55, %v330_v61 }
  0x99   : > { %1307 = vrcp.f32 %v422_v40  ;;  %v416_v47 = vmul.f32 0.3275911, %v408_v42  ;;  %v1442_v63 = vmul.f32 0.70710677, %v1435_v58  ;;  %v1445_v1 = vmul.f32 0.70710677, %v1437_v59 }
  0x9a   : > { %v423_v51 = vadd.f32 1.0, %v415_v46  ;;  %v1450_v3 = vmul.f32 0.70710677, %v1439_v62  ;;  %v518_v4 = vmul.f32 %v510_v57, %v406_v28  ;;  %v529_v6 = vmul.f32 1.442695, %v517_v60 }
  0x9b   : > { %v424_v52 = vadd.f32 1.0, %v416_v47  ;;  %v403_v5 = vand.u32 2147483647, %v1442_v63  ;;  %v511_v7 = vsub.f32 0.0, %v407_v41  ;;  %v404_v8 = vand.u32 2147483647, %v1445_v1 }
  0x9c   : > { %1309 = vrcp.f32 %v423_v51  ;;  %v512_v9 = vsub.f32 0.0, %v408_v42  ;;  %v1455_v11 = vmul.f32 0.70710677, %v1447_v2  ;;  %v401_v13 = vand.u32 2147483647, %v1450_v3 }
  0x9d   : > { %1311 = vrcp.f32 %v424_v52  ;;  %v411_v10 = vmul.f32 0.3275911, %v403_v5  ;;  %v412_v12 = vmul.f32 0.3275911, %v404_v8  ;;  %v531_v16 = vmul.f32 1.442695, %v518_v4 }
  0x9e   : > { %v402_v18 = vand.u32 2147483647, %v1455_v11  ;;  %1313 = vpow2.f32 %v529_v6  ;;  %v519_v25 = vmul.f32 %v511_v7, %v407_v41  ;;  %v520_v28 = vmul.f32 %v512_v9, %v408_v42 }
  0x9f   : > { %v419_v17 = vadd.f32 1.0, %v411_v10  ;;  %v420_v26 = vadd.f32 1.0, %v412_v12  ;;  %v409_v31 = vmul.f32 0.3275911, %v401_v13  ;;  %v507_v37 = vsub.f32 0.0, %v403_v5 }
  0xa0   : > { %v410_v33 = vmul.f32 0.3275911, %v402_v18  ;;  %v533_v41 = vmul.f32 1.442695, %v519_v25  ;;  %v508_v43 = vsub.f32 0.0, %v404_v8  ;;  %v505_v49 = vsub.f32 0.0, %v401_v13 }
  0xa1   : > { %1315 = vrcp.f32 %v419_v17  ;;  %v417_v38 = vadd.f32 1.0, %v409_v31  ;;  %v535_v46 = vmul.f32 1.442695, %v520_v28  ;;  %v515_v52 = vmul.f32 %v507_v37, %v403_v5 }
  0xa2   : > { %1317 = vrcp.f32 %v420_v26  ;;  %v418_v44 = vadd.f32 1.0, %v410_v33  ;;  %v516_v55 = vmul.f32 %v508_v43, %v404_v8  ;;  %v506_v60 = vsub.f32 0.0, %v402_v18 }
  0xa3   : > { %1319 = vpow2.f32 %v531_v16  ;;  %v513_v6 = vmul.f32 %v505_v49, %v401_v13  ;;  %v525_v5 = vmul.f32 1.442695, %v515_v52  ;;  %v1346_v10 = vmov -1.0  }
  0xa4   : > { %1321 = vrcp.f32 %v417_v38  ;;  %v397_v12 = vsel %vm389_vm0, 1.0, %v1346_v10  ;;  %v527_v17 = vmul.f32 1.442695, %v516_v55  ;;  %v398_v25 = vsel %vm390_vm1, 1.0, %v1346_v10 }
  0xa5   : > { %v1458_v14 = vpop.eup %1305  ;;  %1323 = vrcp.f32 %v418_v44  ;;  %vm391_vm2 = vcmp.ge.f32.partialorder %v1428_v35, 0.0  ;;  %vm392_vm3 = vcmp.ge.f32.partialorder %v1431_v36, 0.0  ;;  %v375_v36 = vmul.f32 0.5, %v1423_v29 }
  0xa6   : > { %v1463_v21 = vpop.eup %1307  ;;  %v437_v22 = vmul.f32 1.0614054, %v1458_v14  ;;  %1325 = vpow2.f32 %v533_v41  ;;  %vm387_vm4 = vcmp.ge.f32.partialorder %v1442_v63, 0.0  ;;  %vm388_vm5 = vcmp.ge.f32.partialorder %v1445_v1, 0.0 }
  0xa7   : > { %v438_v27 = vmul.f32 1.0614054, %v1463_v21  ;;  %1327 = vpow2.f32 %v535_v46  ;;  %v396_v63 = vsel %vm388_vm5, 1.0, %v1346_v10  ;;  %vm385_vm6 = vcmp.ge.f32.partialorder %v1450_v3, 0.0 }
  0xa8   : > { %v445_v19 = vadd.f32 -1.4531521, %v437_v22  ;;  %1329 = vpow2.f32 %v525_v5  ;;  %vm386_vm7 = vcmp.ge.f32.partialorder %v1455_v11, 0.0 }
  0xa9   : > { %v446_v34 = vadd.f32 -1.4531521, %v438_v27  ;;  %v1470_v39 = vpop.eup %1309  ;;  %v514_v27 = vmul.f32 %v506_v60, %v402_v18  ;;  %1331 = vpow2.f32 %v527_v17 }
  0xaa   : > { %v453_v40 = vmul.f32 %v1458_v14, %v445_v19  ;;  %v1473_v42 = vpop.eup %1311  ;;  %v439_v20 = vmul.f32 1.0614054, %v1470_v39  ;;  %v521_v19 = vmul.f32 1.442695, %v513_v6 }
  0xab   : > { %v454_v45 = vmul.f32 %v1463_v21, %v446_v34  ;;  %v440_v48 = vmul.f32 1.0614054, %v1473_v42  ;;  %v1314_v22 = vpop.eup %1313 }
  0xac   : > { %v461_v47 = vadd.f32 1.4214138, %v453_v40  ;;  %v447_v51 = vadd.f32 -1.4531521, %v439_v20  ;;  %v523_v20 = vmul.f32 1.442695, %v514_v27  ;;  %1333 = vpow2.f32 %v521_v19 }
  0xad   : > { %v462_v50 = vadd.f32 1.4214138, %v454_v45  ;;  %v448_v54 = vadd.f32 -1.4531521, %v440_v48 }
  0xae   : > { %v469_v53 = vmul.f32 %v1458_v14, %v461_v47  ;;  %v455_v57 = vmul.f32 %v1470_v39, %v447_v51  ;;  %v1493_v28 = vpop.eup %1315  ;;  %1335 = vpow2.f32 %v523_v20 }
  0xaf   : > { %v470_v56 = vmul.f32 %v1463_v21, %v462_v50  ;;  %v456_v4 = vmul.f32 %v1473_v42, %v448_v54  ;;  %v1497_v33 = vpop.eup %1317  ;;  %v435_v37 = vmul.f32 1.0614054, %v1493_v28 }
  0xb0   : > { %v477_v61 = vadd.f32 -0.28449672, %v469_v53  ;;  %v463_v9 = vadd.f32 1.4214138, %v455_v57  ;;  %v1320_v38 = vpop.eup %1319  ;;  %v436_v41 = vmul.f32 1.0614054, %v1497_v33 }
  0xb1   : > { %v478_v7 = vadd.f32 -0.28449672, %v470_v56  ;;  %v464_v16 = vadd.f32 1.4214138, %v456_v4  ;;  %v443_v45 = vadd.f32 -1.4531521, %v435_v37  ;;  %v1505_v46 = vpop.eup %1321 }
  0xb2   : > { %v485_v8 = vmul.f32 %v1458_v14, %v477_v61  ;;  %v471_v13 = vmul.f32 %v1470_v39, %v463_v9  ;;  %v444_v49 = vadd.f32 -1.4531521, %v436_v41  ;;  %v1508_v50 = vpop.eup %1323  ;;  %v433_v53 = vmul.f32 1.0614054, %v1505_v46 }
  0xb3   : > { %v486_v26 = vmul.f32 %v1463_v21, %v478_v7  ;;  %v472_v23 = vmul.f32 %v1473_v42, %v464_v16  ;;  %v451_v52 = vmul.f32 %v1493_v28, %v443_v45  ;;  %v434_v56 = vmul.f32 1.0614054, %v1508_v50  ;;  %v1326_v6 = vpop.eup %1325 }
  0xb4   : > { %v493_v31 = vadd.f32 0.2548296, %v485_v8  ;;  %v479_v24 = vadd.f32 -0.28449672, %v471_v13  ;;  %v452_v55 = vmul.f32 %v1497_v33, %v444_v49  ;;  %v441_v4 = vadd.f32 -1.4531521, %v433_v53  ;;  %v1328_v8 = vpop.eup %1327 }
  0xb5   : > { %v494_v34 = vadd.f32 0.2548296, %v486_v26  ;;  %v480_v40 = vadd.f32 -0.28449672, %v472_v23  ;;  %v459_v61 = vadd.f32 1.4214138, %v451_v52 }
  0xb6   : > { %v501_v18 = vmul.f32 %v1458_v14, %v493_v31  ;;  %v487_v44 = vmul.f32 %v1470_v39, %v479_v24  ;;  %v460_v9 = vadd.f32 1.4214138, %v452_v55  ;;  %v442_v5 = vadd.f32 -1.4531521, %v434_v56 }
  0xb7   : > { %v502_v43 = vmul.f32 %v1463_v21, %v494_v34  ;;  %v488_v48 = vmul.f32 %v1473_v42, %v480_v40  ;;  %v449_v26 = vmul.f32 %v1505_v46, %v441_v4 }
  0xb8   : > { %v541_v47 = vmul.f32 %v1314_v22, %v501_v18  ;;  %v495_v51 = vadd.f32 0.2548296, %v487_v44  ;;  %v467_v22 = vmul.f32 %v1493_v28, %v459_v61  ;;  %v468_v31 = vmul.f32 %v1497_v33, %v460_v9 }
  0xb9   : > { %v542_v14 = vmul.f32 %v1320_v38, %v502_v43  ;;  %v496_v54 = vadd.f32 0.2548296, %v488_v48  ;;  %v457_v34 = vadd.f32 1.4214138, %v449_v26  ;;  %v1330_v43 = vpop.eup %1329 }
  0xba   : > { %v549_v21 = vsub.f32 1.0, %v541_v47  ;;  %v503_v60 = vmul.f32 %v1470_v39, %v495_v51  ;;  %v450_v39 = vmul.f32 %v1508_v50, %v442_v5  ;;  %v475_v19 = vadd.f32 -0.28449672, %v467_v22  ;;  %v1332_v47 = vpop.eup %1331 }
  0xbb   : > { %v550_v57 = vsub.f32 1.0, %v542_v14  ;;  %v504_v7 = vmul.f32 %v1473_v42, %v496_v54  ;;  %v399_v42 = vsel %vm391_vm2, 1.0, %v1346_v10  ;;  %v476_v37 = vadd.f32 -0.28449672, %v468_v31  ;;  %v1334_v54 = vpop.eup %1333 }
  0xbc   : > { %v557_v16 = vmul.f32 %v549_v21, %v397_v12  ;;  %v543_v17 = vmul.f32 %v1326_v6, %v503_v60  ;;  %v400_v12 = vsel %vm392_vm3, 1.0, %v1346_v10  ;;  %v458_v38 = vadd.f32 1.4214138, %v450_v39 }
  0xbd   : > { %v558_v13 = vmul.f32 %v550_v57, %v398_v25  ;;  %v544_v27 = vmul.f32 %v1328_v8, %v504_v7  ;;  %v483_v40 = vmul.f32 %v1493_v28, %v475_v19  ;;  %v465_v41 = vmul.f32 %v1505_v46, %v457_v34  ;;  %v1336_v8 = vpop.eup %1335 }
  0xbe   : > { %v551_v23 = vsub.f32 1.0, %v543_v17  ;;  %v565_v25 = vadd.f32 1.0, %v557_v16  ;;  %v484_v45 = vmul.f32 %v1497_v33, %v476_v37  ;;  %v466_v20 = vmul.f32 %v1508_v50, %v458_v38 }
  0xbf   : > { %v552_v24 = vsub.f32 1.0, %v544_v27  ;;  %v566_v44 = vadd.f32 1.0, %v558_v13  ;;  %v491_v49 = vadd.f32 0.2548296, %v483_v40  ;;  %v473_v14 = vadd.f32 -0.28449672, %v465_v41 }
  0xc0   : > { %v559_v18 = vmul.f32 %v551_v23, %v399_v42  ;;  %v376_v51 = vmul.f32 0.5, %v1425_v30  ;;  %v492_v53 = vadd.f32 0.2548296, %v484_v45  ;;  %v474_v21 = vadd.f32 -0.28449672, %v466_v20 }
  0xc1   : > { %v560_v35 = vmul.f32 %v552_v24, %v400_v12  ;;  %v573_v55 = vmul.f32 %v565_v25, %v1460_v15  ;;  %v499_v57 = vmul.f32 %v1493_v28, %v491_v49  ;;  %v481_v60 = vmul.f32 %v1505_v46, %v473_v14  ;;  %v1271_v45 = vld [vmem:[%s1668_s4 + $0xc] sm:$0x3]  ;;  %v1273_v20 = vld [vmem:[%s1668_s4 + $0xe] sm:$0x3] }
  0xc2   : > { %v567_v48 = vadd.f32 1.0, %v559_v18  ;;  %v574_v61 = vmul.f32 %v566_v44, %v1468_v32  ;;  %v500_v29 = vmul.f32 %v1497_v33, %v492_v53  ;;  %v482_v6 = vmul.f32 %v1508_v50, %v474_v21 }
  0xc3   : > { %v568_v52 = vadd.f32 1.0, %v560_v35  ;;  %v539_v30 = vmul.f32 %v1330_v43, %v499_v57  ;;  %v489_v9 = vadd.f32 0.2548296, %v481_v60  ;;  %v395_v33 = vsel %vm387_vm4, 1.0, %v1346_v10  ;;  %v1269_v35 = vld [vmem:[%s1668_s4 + $0xa] sm:$0x3] }
  0xc4   : > { %v575_v56 = vmul.f32 %v567_v48, %v375_v36  ;;  %v540_v15 = vmul.f32 %v1332_v47, %v500_v29  ;;  %v490_v28 = vadd.f32 0.2548296, %v482_v6  ;;  %v393_v39 = vsel %vm385_vm6, 1.0, %v1346_v10  ;;  %v1275_v47 = vld [vmem:[%s1668_s4 + $0x10] sm:$0x3] }
  0xc5   : > { %v576_v4 = vmul.f32 %v568_v52, %v376_v51  ;;  %v547_v16 = vsub.f32 1.0, %v539_v30  ;;  %v497_v32 = vmul.f32 %v1505_v46, %v489_v9  ;;  %v371_v23 = vmul.f32 0.5, %v1435_v58  ;;  %v585_v58 = vld [vmem:[%s1668_s4] sm:$0x3] }
  0xc6   : > { %v1538_v7 = vpack.c.bf16 %v575_v56, %v573_v55  ;;  %v548_v17 = vsub.f32 1.0, %v540_v15  ;;  %v498_v22 = vmul.f32 %v1508_v50, %v490_v28  ;;  %v394_v19 = vsel %vm386_vm7, 1.0, %v1346_v10  ;;  %v1267_v10 = vld [vmem:[%s1668_s4 + $0x8] sm:$0x3] }
  0xc7   : > { %v1541_v5 = vpack.c.bf16 %v576_v4, %v574_v61  ;;  %v555_v26 = vmul.f32 %v547_v16, %v395_v33  ;;  %v537_v1 = vmul.f32 %v1334_v54, %v497_v32  ;;  %v372_v34 = vmul.f32 0.5, %v1437_v59  ;;  %v1261_v59 = vld [vmem:[%s1668_s4 + $0x2] sm:$0x3] }
  0xc8   : > { %v556_v46 = vmul.f32 %v548_v17, %v396_v63  ;;  %v538_v13 = vmul.f32 %v1336_v8, %v498_v22  ;;  %v369_v37 = vmul.f32 0.5, %v1439_v62  ;;  %v370_v25 = vmul.f32 0.5, %v1447_v2  ;;  %v1263_v62 = vld [vmem:[%s1668_s4 + $0x4] sm:$0x3]  ;;  %v1265_v2 = vld [vmem:[%s1668_s4 + $0x6] sm:$0x3] }
  0xc9   : > { %602 = vmatprep.subr.bf16.mxu0 %v1541_v5  ;;  %669 = vmatprep.subr.bf16.mxu1 %v1541_v5  ;;  %v563_v27 = vadd.f32 1.0, %v555_v26  ;;  %v545_v50 = vsub.f32 1.0, %v537_v1 }
  0xca   : > { %603 = vmatpush1.bf16.msra.mxu0 %v1538_v7  ;;  %670 = vmatpush1.bf16.msra.mxu1 %v1538_v7  ;;  %v564_v31 = vadd.f32 1.0, %v556_v46  ;;  %v546_v42 = vsub.f32 1.0, %v538_v13  ;;  %v1155_v13 = vld [vmem:[%s1669_s5] sm:$0xf] }
  0xcb   : > { %v553_v3 = vmul.f32 %v545_v50, %v393_v39  ;;  %v571_v24 = vmul.f32 %v563_v27, %v371_v23 }
  0xcc   : > { %v554_v12 = vmul.f32 %v546_v42, %v394_v19  ;;  %v572_v11 = vmul.f32 %v564_v31, %v372_v34  ;;  %v635_v19 = vlaneseq }
  0xcd   : > { %v561_v38 = vadd.f32 1.0, %v553_v3 }
  0xce   : > { %v562_v18 = vadd.f32 1.0, %v554_v12  ;;  %v1624_v12 = vshrl.u32 %v635_v19, 7 }
  0xcf   : > { %v569_v40 = vmul.f32 %v561_v38, %v369_v37 }
  0xd0   : > { %v570_v41 = vmul.f32 %v562_v18, %v370_v25  ;;  %v707_v37 = vsub.s32 1, %v1624_v12  ;;  %v642_v38 = vsub.s32 0, %v1624_v12  ;;  %v772_v25 = vsub.s32 2, %v1624_v12 }
  0xd1   : > { %v577_v43 = vpack.c.bf16 %v571_v24, %v569_v40  ;;  %v1626_v24 = vand.u32 127, %v635_v19 }
  0xd2   : > { %v578_v44 = vpack.c.bf16 %v572_v11, %v570_v41  ;;  %v581_v11 = vld [vmem:[%s1667_s3] sm:$0xff]  ;;  %v582_v41 = vld [vmem:[%s1667_s3 + $0x8] sm:$0xff] }
  0xd3   : > { %vm702_vm9 = vcmp.lt.s32.totalorder %v1626_v24, 16  ;;  %vm637_vm10 = vcmp.lt.s32.totalorder %v1626_v24, 17  ;;  %vm767_vm11 = vcmp.lt.s32.totalorder %v1626_v24, 15  ;;  %vm832_vm12 = vcmp.lt.s32.totalorder %v1626_v24, 1 }
  0xd4   : > { %604 = vmatprep.subr.bf16.mxu0 %v578_v44  ;;  %671 = vmatprep.subr.bf16.mxu1 %v578_v44  ;;  %vm945_vm13 = vcmp.lt.s32.totalorder %v1626_v24, 127  ;;  %vm1010_vm14 = vcmp.lt.s32.totalorder %v1626_v24, 113  ;;  %vm1075_vm15 = vcmp.lt.s32.totalorder %v1626_v24, 112  ;;  %vm1140_vm0 = vcmp.lt.s32.totalorder %v1626_v24, 111  ;;  %v1278_v24 = vld [vmem:[%s1667_s3 + $0x18] ss:$0 sm:$0xff] }
  0xd5   : > { %605 = vmatpush1.bf16.msra.mxu0 %v577_v43  ;;  %672 = vmatpush1.bf16.msra.mxu1 %v577_v43 }
  0xd6   : > { %734 = vmatprep.subr.bf16.mxu0 %v1541_v5  ;;  %799 = vmatprep.subr.bf16.mxu1 %v1541_v5 }
  0xd8   : > { %1260 = vmatmul.mubr.msk.bf16.vlgmr.msra.gmra.mxu0 %vm586_vm8, %v585_v58  ;;  %1262 = vmatmul.mubr.msk.bf16.vlgmr.msra.gmra.mxu1 %vm586_vm8, %v1261_v59  ;;  %v837_v58 = vsub.s32 3, %v1624_v12  ;;  %v643_v59 = vrot.slane %v581_v11, %v642_v38 }
  0xd9   : > { %735 = vmatpush1.bf16.msra.mxu0 %v1538_v7  ;;  %800 = vmatpush1.bf16.msra.mxu1 %v1538_v7 }
  0xda   : > { %736 = vmatprep.subr.bf16.mxu0 %v578_v44  ;;  %801 = vmatprep.subr.bf16.mxu1 %v578_v44 }
  0xdb   : > { %754 = vmatprep.mubr.bf16.mxu0 %v1345_v0  ;;  %819 = vmatprep.mubr.bf16.mxu1 %v1345_v0 }
  0xdd   : > { %737 = vmatpush1.bf16.msra.mxu0 %v577_v43  ;;  %802 = vmatpush1.bf16.msra.mxu1 %v577_v43 }
  0xde   : > { %864 = vmatprep.subr.bf16.mxu0 %v1541_v5  ;;  %912 = vmatprep.subr.bf16.mxu1 %v1541_v5 }
  0xe0   : > { %1264 = vmatmul.mubr.msk.bf16.vlgmr.msra.gmra.mxu0 %vm586_vm8, %v1263_v62  ;;  %1266 = vmatmul.mubr.msk.bf16.vlgmr.msra.gmra.mxu1 %vm586_vm8, %v1265_v2 }
  0xe1   : > { %865 = vmatpush1.bf16.msra.mxu0 %v1538_v7  ;;  %913 = vmatpush1.bf16.msra.mxu1 %v1538_v7 }
  0xe2   : > { %866 = vmatprep.subr.bf16.mxu0 %v578_v44  ;;  %914 = vmatprep.subr.bf16.mxu1 %v578_v44 }
  0xe3   : > { %884 = vmatprep.mubr.bf16.mxu0 %v1345_v0  ;;  %932 = vmatprep.mubr.bf16.mxu1 %v1345_v0 }
  0xe5   : > { %867 = vmatpush1.bf16.msra.mxu0 %v577_v43  ;;  %915 = vmatpush1.bf16.msra.mxu1 %v577_v43 }
  0xe6   : > { %977 = vmatprep.subr.bf16.mxu0 %v1541_v5  ;;  %1042 = vmatprep.subr.bf16.mxu1 %v1541_v5 }
  0xe8   : > { %1268 = vmatmul.mubr.msk.bf16.vlgmr.msra.gmra.mxu0 %vm586_vm8, %v1267_v10  ;;  %1270 = vmatmul.mubr.msk.bf16.vlgmr.msra.gmra.mxu1 %vm586_vm8, %v1269_v35  ;;  %v647_v10 = vrot.slane %v582_v41, %v642_v38  ;;  %v773_v35 = vrot.slane %v581_v11, %v772_v25 }
  0xe9   : > { %978 = vmatpush1.bf16.msra.mxu0 %v1538_v7  ;;  %1043 = vmatpush1.bf16.msra.mxu1 %v1538_v7 }
  0xea   : > { %979 = vmatprep.subr.bf16.mxu0 %v578_v44  ;;  %1044 = vmatprep.subr.bf16.mxu1 %v578_v44 }
  0xeb   : > { %997 = vmatprep.mubr.bf16.mxu0 %v1345_v0  ;;  %1062 = vmatprep.mubr.bf16.mxu1 %v1345_v0 }
  0xed   : > { %980 = vmatpush1.bf16.msra.mxu0 %v577_v43  ;;  %1045 = vmatpush1.bf16.msra.mxu1 %v577_v43 }
  0xee   : > { %1107 = vmatprep.subr.bf16.mxu0 %v1541_v5 }
  0xf0   : > { %1272 = vmatmul.mubr.msk.bf16.vlgmr.msra.gmra.mxu0 %vm586_vm8, %v1271_v45  ;;  %1274 = vmatmul.mubr.msk.bf16.vlgmr.msra.gmra.mxu1 %vm586_vm8, %v1273_v20  ;;  %v777_v45 = vrot.slane %v582_v41, %v772_v25 }
  0xf1   : > { %1108 = vmatpush1.bf16.msra.mxu0 %v1538_v7  ;;  %1127 = vmatprep.mubr.bf16.mxu0 %v1345_v0 }
  0xf2   : > { %1109 = vmatprep.subr.bf16.mxu0 %v578_v44  ;;  %v712_v44 = vrot.slane %v582_v41, %v707_v37 }
  0xf5   : > { %1110 = vmatpush1.bf16.msra.mxu0 %v577_v43  ;;  %v708_v43 = vrot.slane %v581_v11, %v707_v37 }
  0xf8   : > { %1276 = vmatmul.mubr.msk.bf16.vlgmr.msra.gmra.mxu0 %vm586_vm8, %v1275_v47 }
 0x198   : > { %v624_v36 = vpop.f32.mrf.mxu0  ;;  %v691_v48 = vpop.f32.mrf.mxu1 }
 0x199   : > { %631 = vrot.lane.b32.xlu0 %v624_v36, %s1347_s29 }
 0x19a   : > { %v693_v49 = vpop.f32.mrf.mxu1  ;;  %v626_v14 = vpop.f32.mrf.mxu0 }
 0x19b   : > { %633 = vrot.lane.b32.xlu1 %v626_v14, %s1347_s29 }
 0x19c   : > { %v628_v51 = vpop.f32.mrf.mxu0  ;;  %v695_v52 = vpop.f32.mrf.mxu1 }
 0x19d   : > { %698 = vrot.lane.b32.xlu0 %v691_v48, %s1348_s30  ;;  %v838_v52 = vrot.slane %v581_v11, %v837_v58 }
 0x19e   : > { %v696_v0 = vpop.f32.mrf.mxu1  ;;  %v629_v53 = vpop.f32.mrf.mxu0 }
 0x19f   : > { %700 = vrot.lane.b32.xlu1 %v693_v49, %s1348_s30  ;;  %v842_v0 = vrot.slane %v582_v41, %v837_v58 }
 0x1a0   : > { %v756_v21 = vpop.f32.mrf.mxu0  ;;  %v821_v54 = vpop.f32.mrf.mxu1 }
 0x1a1   : > { %763 = vrot.lane.b32.xlu0 %v756_v21, %s1349_s7 }
 0x1a2   : > { %v823_v55 = vpop.f32.mrf.mxu1  ;;  %v758_v56 = vpop.f32.mrf.mxu0 }
 0x1a3   : > { %765 = vrot.lane.b32.xlu1 %v758_v56, %s1349_s7 }
 0x1a4   : > { %v760_v57 = vpop.f32.mrf.mxu0  ;;  %v825_v60 = vpop.f32.mrf.mxu1 }
 0x1a5   : > { %828 = vrot.lane.b32.xlu0 %v821_v54, %s1350_s8 }
 0x1a6   : > { %v826_v61 = vpop.f32.mrf.mxu1  ;;  %v761_v4 = vpop.f32.mrf.mxu0 }
 0x1a7   : > { %830 = vrot.lane.b32.xlu1 %v823_v55, %s1350_s8  ;;  %v950_v4 = vsub.s32 5, %v1624_v12 }
 0x1a8   : > { %v1617_v29 = vpop.f32.mrf.mxu0  ;;  %v934_v6 = vpop.f32.mrf.mxu1 }
 0x1a9   : > { %941 = vrot.lane.b32.xlu0 %v934_v6, %s1351_s9 }
 0x1aa   : > { %v1619_v7 = vpop.f32.mrf.mxu0  ;;  %v936_v30 = vpop.f32.mrf.mxu1 }
 0x1ab   : > { %943 = vrot.lane.b32.xlu1 %v936_v30, %s1351_s9 }
 0x1ac   : > { %v890_v9 = vpop.f32.mrf.mxu0  ;;  %v938_v5 = vpop.f32.mrf.mxu1 }
 0x1ae   : > { %v891_v15 = vpop.f32.mrf.mxu0  ;;  %v939_v28 = vpop.f32.mrf.mxu1 }
 0x1b0   : > { %v999_v8 = vpop.f32.mrf.mxu0  ;;  %v1064_v16 = vpop.f32.mrf.mxu1 }
 0x1b1   : > { %1006 = vrot.lane.b32.xlu0 %v999_v8, %s1352_s10 }
 0x1b2   : > { %v1001_v32 = vpop.f32.mrf.mxu0  ;;  %v1066_v33 = vpop.f32.mrf.mxu1 }
 0x1b3   : > { %1008 = vrot.lane.b32.xlu1 %v1001_v32, %s1352_s10  ;;  %v1080_v32 = vsub.s32 7, %v1624_v12 }
 0x1b4   : > { %v1003_v17 = vpop.f32.mrf.mxu0  ;;  %v1068_v22 = vpop.f32.mrf.mxu1 }
 0x1b5   : > { %1071 = vrot.lane.b32.xlu0 %v1064_v16, %s1353_s11  ;;  %v1015_v16 = vsub.s32 6, %v1624_v12 }
 0x1b6   : > { %v1004_v63 = vpop.f32.mrf.mxu0  ;;  %v1069_v26 = vpop.f32.mrf.mxu1 }
 0x1b7   : > { %1073 = vrot.lane.b32.xlu1 %v1066_v33, %s1353_s11  ;;  %v951_v33 = vrot.slane %v581_v11, %v950_v4  ;;  %v955_v63 = vrot.slane %v582_v41, %v950_v4 }
 0x1b8   : > { %v1129_v1 = vpop.f32.mrf.mxu0 }
 0x1b9   : > { %1136 = vrot.lane.b32.xlu0 %v1129_v1, %s1354_s12 }
 0x1ba   : > { %v1131_v46 = vpop.f32.mrf.mxu0 }
 0x1bb   : > { %1138 = vrot.lane.b32.xlu1 %v1131_v46, %s1354_s12 }
 0x1bc   : > { %v1133_v27 = vpop.f32.mrf.mxu0 }
 0x1bd   : > { %1158 = vperm.xlu0 %1303, %v1155_v13   ;;  %v1016_v27 = vrot.slane %v581_v11, %v1015_v16 }
 0x1be   : > { %v1134_v50 = vpop.f32.mrf.mxu0 }
 0x1bf   : > { %v1020_v50 = vrot.slane %v582_v41, %v1015_v16 }
 0x20b   : > { %v632_v31 = vpop.permute.xlu0 %631 }
 0x20d   : > { %v634_v39 = vpop.permute.xlu1 %633 }
 0x20e   : > { %v638_v47 = vsel %vm637_vm10, %v632_v31, %v634_v39  ;;  %v639_v36 = vsel %vm637_vm10, %v634_v39, %v632_v31  ;;  %v1081_v31 = vrot.slane %v581_v11, %v1080_v32  ;;  %v1277_v11 = vld [vmem:[%s1667_s3 + $0x10] ss:$0 sm:$0xff] }
 0x20f   : > { %v699_v42 = vpop.permute.xlu0 %698  ;;  %v648_v55 = vmul.f32 %v643_v59, %v639_v36  ;;  %v649_v56 = vmul.f32 %v647_v10, %v638_v47 }
 0x211   : > { %v701_v23 = vpop.permute.xlu1 %700 }
 0x212   : > { %v703_v62 = vsel %vm702_vm9, %v699_v42, %v701_v23  ;;  %v704_v2 = vsel %vm702_vm9, %v701_v23, %v699_v42  ;;  %v1085_v23 = vrot.slane %v582_v41, %v1080_v32 }
 0x213   : > { %v764_v3 = vpop.permute.xlu0 %763  ;;  %v713_v14 = vmul.f32 %v708_v43, %v704_v2  ;;  %v714_v51 = vmul.f32 %v712_v44, %v703_v62 }
 0x215   : > { %v766_v34 = vpop.permute.xlu1 %765  ;;  %v715_v6 = vadd.f32 %v713_v14, %v648_v55  ;;  %v716_v30 = vadd.f32 %v714_v51, %v649_v56 }
 0x216   : > { %v768_v48 = vsel %vm767_vm11, %v764_v3, %v766_v34  ;;  %v769_v49 = vsel %vm767_vm11, %v766_v34, %v764_v3 }
 0x217   : > { %v829_v18 = vpop.permute.xlu0 %828  ;;  %v778_v57 = vmul.f32 %v773_v35, %v769_v49  ;;  %v779_v60 = vmul.f32 %v777_v45, %v768_v48 }
 0x219   : > { %v831_v40 = vpop.permute.xlu1 %830  ;;  %v780_v28 = vadd.f32 %v778_v57, %v715_v6  ;;  %v781_v8 = vadd.f32 %v779_v60, %v716_v30 }
 0x21a   : > { %v833_v21 = vsel %vm832_vm12, %v829_v18, %v831_v40  ;;  %v834_v54 = vsel %vm832_vm12, %v831_v40, %v829_v18 }
 0x21b   : > { %v942_v20 = vpop.permute.xlu0 %941  ;;  %v843_v9 = vmul.f32 %v838_v52, %v834_v54  ;;  %v844_v5 = vmul.f32 %v842_v0, %v833_v21 }
 0x21d   : > { %v944_v53 = vpop.permute.xlu1 %943  ;;  %v845_v17 = vadd.f32 %v843_v9, %v780_v28  ;;  %v846_v22 = vadd.f32 %v844_v5, %v781_v8 }
 0x21e   : > { %v946_v46 = vsel %vm945_vm13, %v942_v20, %v944_v53  ;;  %v947_v13 = vsel %vm945_vm13, %v944_v53, %v942_v20 }
 0x21f   : > { %v893_v19 = vadd.f32 %v1617_v29, %v845_v17  ;;  %v894_v3 = vadd.f32 %v1619_v7, %v846_v22  ;;  %v956_v34 = vmul.f32 %v951_v33, %v946_v46  ;;  %v957_v12 = vmul.f32 %v955_v63, %v947_v13 }
 0x221   : > { %v958_v7 = vadd.f32 %v956_v34, %v893_v19  ;;  %v959_v44 = vadd.f32 %v957_v12, %v894_v3 }
 0x223   : > { %v1007_v61 = vpop.permute.xlu0 %1006 }
 0x225   : > { %v1009_v15 = vpop.permute.xlu1 %1008 }
 0x226   : > { %v1011_v39 = vsel %vm1010_vm14, %v1007_v61, %v1009_v15  ;;  %v1012_v42 = vsel %vm1010_vm14, %v1009_v15, %v1007_v61 }
 0x227   : > { %v1072_v26 = vpop.permute.xlu0 %1071  ;;  %v1021_v18 = vmul.f32 %v1016_v27, %v1011_v39  ;;  %v1022_v40 = vmul.f32 %v1020_v50, %v1012_v42 }
 0x229   : > { %v1074_v1 = vpop.permute.xlu1 %1073  ;;  %v1023_v62 = vadd.f32 %v1021_v18, %v958_v7  ;;  %v1024_v2 = vadd.f32 %v1022_v40, %v959_v44 }
 0x22a   : > { %v1076_v38 = vsel %vm1075_vm15, %v1072_v26, %v1074_v1  ;;  %v1077_v25 = vsel %vm1075_vm15, %v1074_v1, %v1072_v26 }
 0x22b   : > { %v1137_v43 = vpop.permute.xlu0 %1136  ;;  %v1086_v58 = vmul.f32 %v1081_v31, %v1076_v38  ;;  %v1087_v59 = vmul.f32 %v1085_v23, %v1077_v25 }
 0x22d   : > { %v1139_v37 = vpop.permute.xlu1 %1138  ;;  %v1088_v45 = vadd.f32 %v1086_v58, %v1023_v62  ;;  %v1089_v20 = vadd.f32 %v1087_v59, %v1024_v2 }
 0x22e   : > { %v1141_v29 = vsel %vm1140_vm0, %v1137_v43, %v1139_v37  ;;  %v1142_v41 = vsel %vm1140_vm0, %v1139_v37, %v1137_v43 }
 0x22f   : > { %v1151_v10 = vmul.f32 %v1277_v11, %v1141_v29  ;;  %v1152_v35 = vmul.f32 %v1278_v24, %v1142_v41 }
 0x231   : > { %v1153_v47 = vadd.f32 %v1151_v10, %v1088_v45  ;;  %v1154_v36 = vadd.f32 %v1152_v35, %v1089_v20 }
 0x238   : > { %v1159_v48 = vpop.permute.xlu0 %1158 }
 0x239   : > { %v1161_v49 = vadd.f32 %v1159_v48, %v1153_v47  ;;  %v1162_v14 = vadd.f32 %v1159_v48, %v1154_v36 }
 0x23b   : > { %v1165_v51 = vcombine.low %v1161_v49, %v1162_v14 }
 0x23d   : > { %1167 = vst [vmem:[%s291_s28] sm:$0xff] %v1165_v51 }
 0x23e PF: > { %s16_s21 = sadd.s32 1, %s1343_s21  }
 0x23f   : > { %p13_p4 = scmp.ge.s32.totalorder %s16_s21, 4  }
 0x241   :  { %15 = sbr.rel (!%p13_p4) target bundleno = 1 (0x1), region = 88 }

</bundles_post_ra>
